<compile_context>
chip_gen: v5e
topology: v5e:2x2
jax: 0.10.0
libtpu: 0.0.40
codegen_flags: <defaults>
</compile_context>

<pallas_src>
import functools

import jax
import jax.numpy as jnp
import numpy as np
from jax.experimental import pallas as pl
from jax.experimental.pallas import tpu as pltpu


# ----------------------------- host-side constant tables -----------------------------
def _interp_matrix(in_size, out_size, pad):
    """Align-corners linear upsample as a dense (out_size + 2*pad, in_size) matrix.
    The `pad` leading/trailing zero rows double as the conv's spatial zero padding."""
    m = np.zeros((out_size + 2 * pad, in_size), np.float32)
    if in_size == 1:
        m[pad:pad + out_size, 0] = 1.0
        return m
    rho = (in_size - 1) / (out_size - 1)
    for j in range(out_size):
        c = j * rho
        lo = min(int(np.floor(c)), in_size - 2)
        g = c - lo
        m[pad + j, lo] += 1.0 - g
        m[pad + j, lo + 1] += g
    return m


def _depth_tables(D, D2, TD2):
    """Per output-depth tile: low-res window start (scalar prefetch) and, per
    (window row r, plane i, conv depth tap kd), the depth-lerp coefficient."""
    n_tiles = D2 // TD2
    rho = (D - 1) / (D2 - 1) if D2 > 1 else 0.0

    def src(t):                       # align_corners source for upsampled depth t
        if D == 1:
            return 0, 0, 0.0
        c = t * rho
        lo = min(int(np.floor(c)), D - 2)
        return lo, lo + 1, c - lo

    # exact per-tile needed low-res row ranges
    needs = []
    for tt in range(n_tiles):
        rows = set()
        for i in range(TD2):
            d = tt * TD2 + i
            for kd in range(3):
                tpos = d - 1 + kd
                if 0 <= tpos < D2:
                    lo, hi, _ = src(tpos)
                    rows.add(lo)
                    rows.add(hi)
        needs.append((min(rows), max(rows)))
    WIN2 = max(hi - lo + 1 for lo, hi in needs)

    s_tbl = np.zeros((n_tiles,), np.int32)
    coef = np.zeros((n_tiles, WIN2, TD2, 3), np.float32)
    for tt, (lo_t, _hi_t) in enumerate(needs):
        s = max(0, min(lo_t, D - WIN2))
        s_tbl[tt] = s
        for i in range(TD2):
            d = tt * TD2 + i
            for kd in range(3):
                tpos = d - 1 + kd
                if tpos < 0 or tpos >= D2:
                    continue                       # conv zero padding along depth
                lo, hi, g = src(tpos)
                assert s <= lo and hi - s < WIN2, "depth window too small"
                coef[tt, lo - s, i, kd] += 1.0 - g
                coef[tt, hi - s, i, kd] += g
    return s_tbl, coef, WIN2


# ----------------------------------- Pallas kernel -----------------------------------
def _up_conv_relu_kernel(s_ref, act_ref, coef_ref, x_ref, uh_ref, w_ref, b_ref,
                         o_ref, acc_ref, slab_ref, *,
                         TH2, W2, CIN, COUT, TD2, WIN2, compute_dtype):
    del s_ref                                   # consumed by the index maps only
    t = pl.program_id(1)
    r = pl.program_id(3)

    @pl.when(r == 0)
    def _init():
        acc_ref[...] = jnp.zeros_like(acc_ref)

    @pl.when(act_ref[t * WIN2 + r] != 0)        # skip depth-window rows this tile never uses
    def _compute():
        # H-upsample (+ conv H zero-pad rows) of one low-res depth row for this H2 tile:
        # one MXU matmul against the constant interpolation window.
        x2d = x_ref[0, 0].astype(compute_dtype)                       # (H, (W2+2)*CIN)
        uh = uh_ref[0].astype(compute_dtype)                          # (TH2+2, H)
        up = jnp.dot(uh, x2d, preferred_element_type=jnp.float32)     # (TH2+2, (W2+2)*CIN)
        up3 = up.astype(compute_dtype).reshape(TH2 + 2, W2 + 2, CIN)

        # im2col: write the 9 (kh, kw) taps straight into the preallocated slab scratch
        # (one materialization, no concat).  The lane split happens once on `up` above.
        for kh in range(3):
            for kw in range(3):
                tap = kh * 3 + kw
                slab_ref[:, :, tap * CIN:(tap + 1) * CIN] = up3[kh:kh + TH2, kw:kw + W2, :]

        # Depth-lerp x conv-depth-tap folded weights for ALL TD2 planes of this tile:
        # one wide RHS (9*CIN, COUT*TD2), one MXU matmul, one accumulator RMW.
        c = coef_ref[0, 0]                                            # (3, COUT*TD2), f32
        w_eff = (c[0:1, :] * w_ref[0] + c[1:2, :] * w_ref[1]
                 + c[2:3, :] * w_ref[2]).astype(compute_dtype)        # (9*CIN, COUT*TD2)
        slab = slab_ref[...].reshape(TH2 * W2, 9 * CIN)
        acc_ref[...] += jnp.dot(slab, w_eff, preferred_element_type=jnp.float32)

    # Finalize: bias + ReLU, one lane-dense (COUT, TD2, TH2*W2) store per tile.
    @pl.when(r == pl.num_programs(3) - 1)
    def _store():
        y = jnp.maximum(acc_ref[...] + b_ref[...], 0.0)               # (TH2*W2, COUT*TD2)
        o_ref[0] = y.T.reshape(COUT, TD2, TH2 * W2).astype(o_ref.dtype)


# ------------------------------------ module forward ----------------------------------
def upsampling_function_forward(x_ncdhw, w_oidhw, bias, stride=2,
                                compute_dtype=jnp.bfloat16, out_dtype=jnp.float32,
                                td2=None, th2=None, vmem_budget_bytes=None):
    """Upsampling_function(n_in, n_out, stride, 'none', mode_upsampling=1).forward."""
    assert stride >= 2
    N, CIN, D, H, W = x_ncdhw.shape
    COUT, cin2, kd_, kh_, kw_ = w_oidhw.shape
    assert cin2 == CIN and kd_ == kh_ == kw_ == 3
    D2, H2, W2 = stride * D, stride * H, stride * W
    sbytes = jnp.dtype(compute_dtype).itemsize
    obytes = jnp.dtype(out_dtype).itemsize

    # ---- generation-aware VMEM limit and tile selection (v5e/v6e: 128 MiB, v7x: 64 MiB) ----
    try:
        info = pltpu.get_tpu_info()
        vmem_cap = int(getattr(info, "vmem_capacity_bytes", 0)) or 64 * 1024 * 1024
    except Exception:
        vmem_cap = 64 * 1024 * 1024
    vmem_limit = max(32 * 1024 * 1024, min(int(vmem_cap * 0.75), 112 * 1024 * 1024))
    budget = vmem_budget_bytes if vmem_budget_bytes is not None else int(vmem_limit * 0.6)

    def tile_cost(td, th):
        acc = th * W2 * COUT * td * 4                      # f32 accumulator
        outb = 2 * COUT * td * th * W2 * obytes            # double-buffered output block
        slab = th * W2 * 9 * CIN * sbytes                  # im2col scratch
        up = (th + 2) * (W2 + 2) * CIN * 4                 # transient H-upsample result
        xb = 2 * H * (W2 + 2) * CIN * sbytes               # one low-res depth row, x2 buffers
        wrep = 2 * 3 * 9 * CIN * COUT * td * sbytes        # resident folded/replicated weights
        uhb = 2 * (th + 2) * H * 4
        coefb = 2 * 3 * COUT * td * 4
        return acc + outb + slab + up + xb + wrep + uhb + coefb + (1 << 20)

    # TD2 multiple of 8 (or full) keeps the output block's sublane dim aligned;
    # TH2*W2 multiple of 128 (or full) keeps its lane dim dense.
    td_cands = [d for d in range(D2, 0, -1) if D2 % d == 0 and (d == D2 or d % 8 == 0)]
    th_cands = [h for h in range(H2, 0, -1) if H2 % h == 0 and (h == H2 or (h * W2) % 128 == 0)]
    if td2 is not None and th2 is not None:
        TD2, TH2 = td2, th2
        assert D2 % TD2 == 0 and (TD2 == D2 or TD2 % 8 == 0)
        assert H2 % TH2 == 0 and (TH2 == H2 or (TH2 * W2) % 128 == 0)
    else:
        fitting = [(td, th) for td in td_cands for th in th_cands
                   if tile_cost(td, th) <= budget]
        if fitting:
            TD2, TH2 = max(fitting, key=lambda p: (p[0] * p[1], p[0]))
        else:
            # TODO(synk): nothing fits the budget -- take the smallest tile and rely on
            # spill; a further W2 tile axis would be needed for truly huge planes.
            TD2, TH2 = min(((td, th) for td in td_cands for th in th_cands),
                           key=lambda p: tile_cost(*p))
    n_tiles, n_h = D2 // TD2, H2 // TH2

    # ---- host-side constant tables / layout prep ----
    x = jnp.transpose(x_ncdhw, (0, 2, 3, 4, 1)).astype(jnp.float32)       # low-res NDHWC

    # W-axis upsample + conv W zero-pad on the low-res tensor (only ~2x low-res in HBM,
    # stored in the compute dtype); W and CIN are folded into the lane axis.
    uw = jnp.asarray(_interp_matrix(W, W2, pad=1))                        # (W2+2, W)
    xw = jnp.einsum('jw,ndhwc->ndhjc', uw, x, precision=jax.lax.Precision.HIGHEST)
    xw = xw.reshape(N, D, H, (W2 + 2) * CIN).astype(compute_dtype)

    # Per-H2-tile windows of the H interpolation (+pad) matrix: (n_h, TH2+2, H).
    uh_full = _interp_matrix(H, H2, pad=1)                                # (H2+2, H)
    uh_win = jnp.asarray(np.stack([uh_full[hi * TH2: hi * TH2 + TH2 + 2]
                                   for hi in range(n_h)]), dtype=jnp.float32)

    # Conv weights folded for the im2col matmul and replicated cout-major over TD2:
    # w_rep[kd, (kh,kw,ci), co*TD2 + i] = w[co, ci, kd, kh, kw].
    wf = jnp.transpose(w_oidhw, (2, 3, 4, 1, 0)).reshape(3, 9 * CIN, COUT).astype(jnp.float32)
    w_rep = jnp.repeat(wf, TD2, axis=-1).astype(compute_dtype)            # (3, 9*CIN, COUT*TD2)
    b_rep = jnp.repeat(bias.astype(jnp.float32), TD2).reshape(1, COUT * TD2)

    s_np, coef_np, WIN2 = _depth_tables(D, D2, TD2)
    act_np = (np.abs(coef_np).max(axis=(2, 3)) > 0).astype(np.int32).reshape(-1)
    coef_lane = jnp.asarray(np.tile(np.transpose(coef_np, (0, 1, 3, 2)),  # (nt, WIN2, 3, TD2)
                                    (1, 1, 1, COUT)))                     # -> (..., COUT*TD2)
    s_tbl = jnp.asarray(s_np)
    act = jnp.asarray(act_np)

    kern = functools.partial(_up_conv_relu_kernel, TH2=TH2, W2=W2, CIN=CIN, COUT=COUT,
                             TD2=TD2, WIN2=WIN2, compute_dtype=compute_dtype)

    out = pl.pallas_call(
        kern,
        out_shape=jax.ShapeDtypeStruct((N, COUT, D2, H2 * W2), out_dtype),
        grid_spec=pltpu.PrefetchScalarGridSpec(
            num_scalar_prefetch=2,                                        # s_tbl, act flags
            grid=(N, n_tiles, n_h, WIN2),                                 # depth window innermost
            in_specs=[
                pl.BlockSpec((1, 1, 3, COUT * TD2),
                             lambda n, t, h, r, s, a: (t, r, 0, 0)),      # depth-lerp coefs
                pl.BlockSpec((1, 1, H, (W2 + 2) * CIN),
                             lambda n, t, h, r, s, a: (n, s[t] + r, 0, 0)),  # one low-res row
                pl.BlockSpec((1, TH2 + 2, H),
                             lambda n, t, h, r, s, a: (h, 0, 0)),         # H-interp window
                pl.BlockSpec((3, 9 * CIN, COUT * TD2),
                             lambda n, t, h, r, s, a: (0, 0, 0)),         # weights (resident)
                pl.BlockSpec((1, COUT * TD2),
                             lambda n, t, h, r, s, a: (0, 0)),            # bias (resident)
            ],
            out_specs=pl.BlockSpec((1, COUT, TD2, TH2 * W2),
                                   lambda n, t, h, r, s, a: (n, 0, t, h)),
            scratch_shapes=[pltpu.VMEM((TH2 * W2, COUT * TD2), jnp.float32),   # accumulator
                            pltpu.VMEM((TH2, W2, 9 * CIN), compute_dtype)],    # im2col slab
        ),
        compiler_params=pltpu.CompilerParams(
            dimension_semantics=("parallel", "parallel", "parallel", "arbitrary"),
            vmem_limit_bytes=vmem_limit),
    )(s_tbl, act, coef_lane, xw, uh_win, w_rep, b_rep)

    return out.reshape(N, COUT, D2, H2, W2)                               # free reshape -> NCDHW


# -------------------------------- pure-JAX reference -----------------------------------
def _upsample_linear_axis(x, axis, scale):
    in_size = x.shape[axis]
    out_size = in_size * scale
    if in_size == 1:
        return jnp.repeat(x, out_size, axis=axis)
    coords = jnp.arange(out_size, dtype=jnp.float32) * (in_size - 1) / (out_size - 1)
    lo = jnp.clip(jnp.floor(coords).astype(jnp.int32), 0, in_size - 2)
    frac = coords - lo.astype(jnp.float32)
    shape = [1] * x.ndim
    shape[axis] = out_size
    frac = frac.reshape(shape)
    return jnp.take(x, lo, axis=axis) * (1.0 - frac) + jnp.take(x, lo + 1, axis=axis) * frac


def _reference(x_ncdhw, w_oidhw, bias, stride=2):
    x = jnp.transpose(x_ncdhw, (0, 2, 3, 4, 1))
    for ax in (1, 2, 3):
        x = _upsample_linear_axis(x, ax, stride)
    w = jnp.transpose(w_oidhw, (2, 3, 4, 1, 0))
    y = jax.lax.conv_general_dilated(
        x, w, window_strides=(1, 1, 1), padding="SAME",
        dimension_numbers=("NDHWC", "DHWIO", "NDHWC"),
        precision=jax.lax.Precision.HIGHEST)
    y = jnp.maximum(y + bias, 0.0)
    return jnp.transpose(y, (0, 4, 1, 2, 3))


if __name__ == "__main__":
    key = jax.random.PRNGKey(0)
    k1, k2, k3, k4, k5, k6 = jax.random.split(key, 6)

    # Config 1: N=2, Cin=4, Cout=8, low-res 8x4x4 -> upsampled 16x8x8 (auto tiling).
    N, CIN, COUT, D, H, W = 2, 4, 8, 8, 4, 4
    x = jax.random.normal(k1, (N, CIN, D, H, W), dtype=jnp.float32)
    w = jax.random.normal(k2, (COUT, CIN, 3, 3, 3), dtype=jnp.float32) / np.sqrt(CIN * 27)
    b = 0.1 * jax.random.normal(k3, (COUT,), dtype=jnp.float32)
    ref = np.asarray(_reference(x, w, b, stride=2))

    # f32 compute path: tight check of the fused upsample + conv + ReLU math.
    out_f32 = jax.block_until_ready(
        upsampling_function_forward(x, w, b, stride=2, compute_dtype=jnp.float32))
    assert out_f32.shape == (N, COUT, 2 * D, 2 * H, 2 * W)
    np.testing.assert_allclose(np.asarray(out_f32), ref, rtol=1e-3, atol=1e-3)

    # Default bf16 MXU-input path (f32 accumulation): looser tolerance.
    out_bf16 = jax.block_until_ready(upsampling_function_forward(x, w, b, stride=2))
    np.testing.assert_allclose(np.asarray(out_bf16), ref, rtol=6e-2, atol=6e-2)

    # Config 2: explicitly exercise the depth (TD2=8) and H2 (TH2=8, n_h=2) tiling paths.
    N2, CIN2, COUT2, D2_, H2_, W2_ = 1, 4, 8, 8, 8, 8
    x2 = jax.random.normal(k4, (N2, CIN2, D2_, H2_, W2_), dtype=jnp.float32)
    w2 = jax.random.normal(k5, (COUT2, CIN2, 3, 3, 3), dtype=jnp.float32) / np.sqrt(CIN2 * 27)
    b2 = 0.1 * jax.random.normal(k6, (COUT2,), dtype=jnp.float32)
    ref2 = np.asarray(_reference(x2, w2, b2, stride=2))
    out2 = jax.block_until_ready(
        upsampling_function_forward(x2, w2, b2, stride=2, compute_dtype=jnp.float32,
                                    td2=8, th2=8))
    np.testing.assert_allclose(np.asarray(out2), ref2, rtol=1e-3, atol=1e-3)

    print("KERNEL_OK")
</pallas_src>

<mosaic_0001>
module attributes {stable_mosaic.version = 11 : i64} {
  func.func @_up_conv_relu_kernel(%arg0: i32, %arg1: i32, %arg2: i32, %arg3: i32, %arg4: memref<1xi32, #tpu.memory_space<smem>>, %arg5: memref<8xi32, #tpu.memory_space<smem>>, %arg6: memref<1x1x3x128xf32, #tpu.memory_space<vmem>>, %arg7: memref<1x1x4x40xf32, #tpu.memory_space<vmem>>, %arg8: memref<1x10x4xf32, #tpu.memory_space<vmem>>, %arg9: memref<3x36x128xf32, #tpu.memory_space<vmem>>, %arg10: memref<1x128xf32, #tpu.memory_space<vmem>>, %arg11: memref<1x8x16x64xf32, #tpu.memory_space<vmem>>, %arg12: memref<64x128xf32, #tpu.memory_space<vmem>>, %arg13: memref<8x8x36xf32, #tpu.memory_space<vmem>>) attributes {dimension_semantics = [#tpu.dimension_semantics<parallel>, #tpu.dimension_semantics<parallel>, #tpu.dimension_semantics<parallel>, #tpu.dimension_semantics<arbitrary>], iteration_bounds = array<i64: 2, 1, 1, 8>, scalar_prefetch = 2 : i64, scratch_operands = 2 : i64, tpu.core_type = #tpu.core_type<tc>, window_params = [{transform_indices = @transform_0, window_bounds = array<i64: 1, 1, 3, 128>}, {transform_indices = @transform_1, window_bounds = array<i64: 1, 1, 4, 40>}, {transform_indices = @transform_2, window_bounds = array<i64: 1, 10, 4>}, {pipeline_mode = #tpu.pipeline_mode<synchronous>, transform_indices = @transform_3, window_bounds = array<i64: 3, 36, 128>}, {pipeline_mode = #tpu.pipeline_mode<synchronous>, transform_indices = @transform_4, window_bounds = array<i64: 1, 128>}, {transform_indices = @transform_5, window_bounds = array<i64: 1, 8, 16, 64>}]} {
    %c0_i32 = arith.constant 0 : i32
    %0 = arith.cmpi eq, %arg3, %c0_i32 : i32
    %1 = arith.extui %0 : i1 to i32
    %c0_i32_0 = arith.constant 0 : i32
    %2 = arith.cmpi ne, %1, %c0_i32_0 : i32
    scf.if %2 {
      %cst = arith.constant 0.000000e+00 : f32
      %13 = vector.broadcast %cst : f32 to vector<64x128xf32>
      %c0 = arith.constant 0 : index
      %c0_4 = arith.constant 0 : index
      %14 = vector.load %arg12[%c0, %c0_4] : memref<64x128xf32, #tpu.memory_space<vmem>>, vector<64x128xf32>
      tpu.vector_store %arg12[%c0, %c0_4], %13 {strides = array<i32>} : memref<64x128xf32, #tpu.memory_space<vmem>>, vector<64x128xf32>,
    } else {
    }
    %c8_i32 = arith.constant 8 : i32
    %3 = arith.muli %arg1, %c8_i32 : i32
    %4 = arith.addi %3, %arg3 : i32
    %5 = arith.index_cast %4 : i32 to index
    %6 = memref.load %arg5[%5] : memref<8xi32, #tpu.memory_space<smem>>
    %c0_i32_1 = arith.constant 0 : i32
    %7 = arith.cmpi ne, %6, %c0_i32_1 : i32
    %8 = arith.extui %7 : i1 to i32
    %c0_i32_2 = arith.constant 0 : i32
    %9 = arith.cmpi ne, %8, %c0_i32_2 : i32
    scf.if %9 {
      %c0 = arith.constant 0 : index
      %c0_4 = arith.constant 0 : index
      %c0_5 = arith.constant 0 : index
      %c0_6 = arith.constant 0 : index
      %13 = vector.load %arg7[%c0, %c0_4, %c0_5, %c0_6] : memref<1x1x4x40xf32, #tpu.memory_space<vmem>>, vector<1x1x4x40xf32>
      %14 = vector.shape_cast %13 : vector<1x1x4x40xf32> to vector<4x40xf32>
      %c0_7 = arith.constant 0 : index
      %c0_8 = arith.constant 0 : index
      %c0_9 = arith.constant 0 : index
      %15 = vector.load %arg8[%c0_7, %c0_8, %c0_9] : memref<1x10x4xf32, #tpu.memory_space<vmem>>, vector<1x10x4xf32>
      %16 = vector.shape_cast %15 : vector<1x10x4xf32> to vector<10x4xf32>
      %cst = arith.constant dense<0.000000e+00> : vector<10x40xf32>
      %17 = tpu.matmul %16, %14, %cst {dimension_numbers = #tpu.dot_dimension_numbers<[1], [0], [0], [1], [0, 0, 1, 1], [], []>} : vector<10x4xf32>, vector<4x40xf32>, vector<10x40xf32> -> vector<10x40xf32>
      %18 = vector.shape_cast %17 : vector<10x40xf32> to vector<10x10x4xf32>
      %19 = vector.extract_strided_slice %18 {offsets = [0, 0, 0], sizes = [8, 8, 4], strides = [1, 1, 1]} : vector<10x10x4xf32> to vector<8x8x4xf32>
      %c0_10 = arith.constant 0 : index
      %c0_11 = arith.constant 0 : index
      %c0_12 = arith.constant 0 : index
      %20 = vector.load %arg13[%c0_10, %c0_11, %c0_12] : memref<8x8x36xf32, #tpu.memory_space<vmem>>, vector<8x8x4xf32>
      tpu.vector_store %arg13[%c0_10, %c0_11, %c0_12], %19 {strides = array<i32>} : memref<8x8x36xf32, #tpu.memory_space<vmem>>, vector<8x8x4xf32>,
      %21 = vector.extract_strided_slice %18 {offsets = [0, 1, 0], sizes = [8, 8, 4], strides = [1, 1, 1]} : vector<10x10x4xf32> to vector<8x8x4xf32>
      %c0_13 = arith.constant 0 : index
      %c0_14 = arith.constant 0 : index
      %c4 = arith.constant 4 : index
      %22 = vector.load %arg13[%c0_13, %c0_14, %c4] : memref<8x8x36xf32, #tpu.memory_space<vmem>>, vector<8x8x4xf32>
      tpu.vector_store %arg13[%c0_13, %c0_14, %c4], %21 {strides = array<i32>} : memref<8x8x36xf32, #tpu.memory_space<vmem>>, vector<8x8x4xf32>,
      %23 = vector.extract_strided_slice %18 {offsets = [0, 2, 0], sizes = [8, 8, 4], strides = [1, 1, 1]} : vector<10x10x4xf32> to vector<8x8x4xf32>
      %c0_15 = arith.constant 0 : index
      %c0_16 = arith.constant 0 : index
      %c8 = arith.constant 8 : index
      %24 = vector.load %arg13[%c0_15, %c0_16, %c8] : memref<8x8x36xf32, #tpu.memory_space<vmem>>, vector<8x8x4xf32>
      tpu.vector_store %arg13[%c0_15, %c0_16, %c8], %23 {strides = array<i32>} : memref<8x8x36xf32, #tpu.memory_space<vmem>>, vector<8x8x4xf32>,
      %25 = vector.extract_strided_slice %18 {offsets = [1, 0, 0], sizes = [8, 8, 4], strides = [1, 1, 1]} : vector<10x10x4xf32> to vector<8x8x4xf32>
      %c0_17 = arith.constant 0 : index
      %c0_18 = arith.constant 0 : index
      %c12 = arith.constant 12 : index
      %26 = vector.load %arg13[%c0_17, %c0_18, %c12] : memref<8x8x36xf32, #tpu.memory_space<vmem>>, vector<8x8x4xf32>
      tpu.vector_store %arg13[%c0_17, %c0_18, %c12], %25 {strides = array<i32>} : memref<8x8x36xf32, #tpu.memory_space<vmem>>, vector<8x8x4xf32>,
      %27 = vector.extract_strided_slice %18 {offsets = [1, 1, 0], sizes = [8, 8, 4], strides = [1, 1, 1]} : vector<10x10x4xf32> to vector<8x8x4xf32>
      %c0_19 = arith.constant 0 : index
      %c0_20 = arith.constant 0 : index
      %c16 = arith.constant 16 : index
      %28 = vector.load %arg13[%c0_19, %c0_20, %c16] : memref<8x8x36xf32, #tpu.memory_space<vmem>>, vector<8x8x4xf32>
      tpu.vector_store %arg13[%c0_19, %c0_20, %c16], %27 {strides = array<i32>} : memref<8x8x36xf32, #tpu.memory_space<vmem>>, vector<8x8x4xf32>,
      %29 = vector.extract_strided_slice %18 {offsets = [1, 2, 0], sizes = [8, 8, 4], strides = [1, 1, 1]} : vector<10x10x4xf32> to vector<8x8x4xf32>
      %c0_21 = arith.constant 0 : index
      %c0_22 = arith.constant 0 : index
      %c20 = arith.constant 20 : index
      %30 = vector.load %arg13[%c0_21, %c0_22, %c20] : memref<8x8x36xf32, #tpu.memory_space<vmem>>, vector<8x8x4xf32>
      tpu.vector_store %arg13[%c0_21, %c0_22, %c20], %29 {strides = array<i32>} : memref<8x8x36xf32, #tpu.memory_space<vmem>>, vector<8x8x4xf32>,
      %31 = vector.extract_strided_slice %18 {offsets = [2, 0, 0], sizes = [8, 8, 4], strides = [1, 1, 1]} : vector<10x10x4xf32> to vector<8x8x4xf32>
      %c0_23 = arith.constant 0 : index
      %c0_24 = arith.constant 0 : index
      %c24 = arith.constant 24 : index
      %32 = vector.load %arg13[%c0_23, %c0_24, %c24] : memref<8x8x36xf32, #tpu.memory_space<vmem>>, vector<8x8x4xf32>
      tpu.vector_store %arg13[%c0_23, %c0_24, %c24], %31 {strides = array<i32>} : memref<8x8x36xf32, #tpu.memory_space<vmem>>, vector<8x8x4xf32>,
      %33 = vector.extract_strided_slice %18 {offsets = [2, 1, 0], sizes = [8, 8, 4], strides = [1, 1, 1]} : vector<10x10x4xf32> to vector<8x8x4xf32>
      %c0_25 = arith.constant 0 : index
      %c0_26 = arith.constant 0 : index
      %c28 = arith.constant 28 : index
      %34 = vector.load %arg13[%c0_25, %c0_26, %c28] : memref<8x8x36xf32, #tpu.memory_space<vmem>>, vector<8x8x4xf32>
      tpu.vector_store %arg13[%c0_25, %c0_26, %c28], %33 {strides = array<i32>} : memref<8x8x36xf32, #tpu.memory_space<vmem>>, vector<8x8x4xf32>,
      %35 = vector.extract_strided_slice %18 {offsets = [2, 2, 0], sizes = [8, 8, 4], strides = [1, 1, 1]} : vector<10x10x4xf32> to vector<8x8x4xf32>
      %c0_27 = arith.constant 0 : index
      %c0_28 = arith.constant 0 : index
      %c32 = arith.constant 32 : index
      %36 = vector.load %arg13[%c0_27, %c0_28, %c32] : memref<8x8x36xf32, #tpu.memory_space<vmem>>, vector<8x8x4xf32>
      tpu.vector_store %arg13[%c0_27, %c0_28, %c32], %35 {strides = array<i32>} : memref<8x8x36xf32, #tpu.memory_space<vmem>>, vector<8x8x4xf32>,
      %c0_29 = arith.constant 0 : index
      %c0_30 = arith.constant 0 : index
      %c0_31 = arith.constant 0 : index
      %c0_32 = arith.constant 0 : index
      %37 = vector.load %arg6[%c0_29, %c0_30, %c0_31, %c0_32] : memref<1x1x3x128xf32, #tpu.memory_space<vmem>>, vector<1x1x3x128xf32>
      %38 = vector.shape_cast %37 : vector<1x1x3x128xf32> to vector<3x128xf32>
      %39 = vector.extract_strided_slice %38 {offsets = [0, 0], sizes = [1, 128], strides = [1, 1]} : vector<3x128xf32> to vector<1x128xf32>
      %c0_33 = arith.constant 0 : index
      %c0_34 = arith.constant 0 : index
      %c0_35 = arith.constant 0 : index
      %40 = vector.load %arg9[%c0_33, %c0_34, %c0_35] : memref<3x36x128xf32, #tpu.memory_space<vmem>>, vector<1x36x128xf32>
      %41 = vector.shape_cast %40 : vector<1x36x128xf32> to vector<36x128xf32>
      %42 = vector.broadcast %39 : vector<1x128xf32> to vector<36x128xf32>
      %43 = arith.mulf %42, %41 : vector<36x128xf32>
      %44 = vector.extract_strided_slice %38 {offsets = [1, 0], sizes = [1, 128], strides = [1, 1]} : vector<3x128xf32> to vector<1x128xf32>
      %c1 = arith.constant 1 : index
      %c0_36 = arith.constant 0 : index
      %c0_37 = arith.constant 0 : index
      %45 = vector.load %arg9[%c1, %c0_36, %c0_37] : memref<3x36x128xf32, #tpu.memory_space<vmem>>, vector<1x36x128xf32>
      %46 = vector.shape_cast %45 : vector<1x36x128xf32> to vector<36x128xf32>
      %47 = vector.broadcast %44 : vector<1x128xf32> to vector<36x128xf32>
      %48 = arith.mulf %47, %46 : vector<36x128xf32>
      %49 = arith.addf %43, %48 : vector<36x128xf32>
      %50 = vector.extract_strided_slice %38 {offsets = [2, 0], sizes = [1, 128], strides = [1, 1]} : vector<3x128xf32> to vector<1x128xf32>
      %c2 = arith.constant 2 : index
      %c0_38 = arith.constant 0 : index
      %c0_39 = arith.constant 0 : index
      %51 = vector.load %arg9[%c2, %c0_38, %c0_39] : memref<3x36x128xf32, #tpu.memory_space<vmem>>, vector<1x36x128xf32>
      %52 = vector.shape_cast %51 : vector<1x36x128xf32> to vector<36x128xf32>
      %53 = vector.broadcast %50 : vector<1x128xf32> to vector<36x128xf32>
      %54 = arith.mulf %53, %52 : vector<36x128xf32>
      %55 = arith.addf %49, %54 : vector<36x128xf32>
      %c0_40 = arith.constant 0 : index
      %c0_41 = arith.constant 0 : index
      %c0_42 = arith.constant 0 : index
      %56 = vector.load %arg13[%c0_40, %c0_41, %c0_42] : memref<8x8x36xf32, #tpu.memory_space<vmem>>, vector<8x8x36xf32>
      %57 = vector.shape_cast %56 : vector<8x8x36xf32> to vector<64x36xf32>
      %c0_43 = arith.constant 0 : index
      %c0_44 = arith.constant 0 : index
      %58 = vector.load %arg12[%c0_43, %c0_44] : memref<64x128xf32, #tpu.memory_space<vmem>>, vector<64x128xf32>
      %cst_45 = arith.constant dense<0.000000e+00> : vector<64x128xf32>
      %59 = tpu.matmul %57, %55, %cst_45 {dimension_numbers = #tpu.dot_dimension_numbers<[1], [0], [0], [1], [0, 0, 1, 1], [], []>} : vector<64x36xf32>, vector<36x128xf32>, vector<64x128xf32> -> vector<64x128xf32>
      %60 = arith.addf %58, %59 : vector<64x128xf32>
      %c0_46 = arith.constant 0 : index
      %c0_47 = arith.constant 0 : index
      %61 = vector.load %arg12[%c0_46, %c0_47] : memref<64x128xf32, #tpu.memory_space<vmem>>, vector<64x128xf32>
      tpu.vector_store %arg12[%c0_46, %c0_47], %60 {strides = array<i32>} : memref<64x128xf32, #tpu.memory_space<vmem>>, vector<64x128xf32>,
    } else {
    }
    %c7_i32 = arith.constant 7 : i32
    %10 = arith.cmpi eq, %arg3, %c7_i32 : i32
    %11 = arith.extui %10 : i1 to i32
    %c0_i32_3 = arith.constant 0 : i32
    %12 = arith.cmpi ne, %11, %c0_i32_3 : i32
    scf.if %12 {
      %c0 = arith.constant 0 : index
      %c0_4 = arith.constant 0 : index
      %13 = vector.load %arg12[%c0, %c0_4] : memref<64x128xf32, #tpu.memory_space<vmem>>, vector<64x128xf32>
      %c0_5 = arith.constant 0 : index
      %c0_6 = arith.constant 0 : index
      %14 = vector.load %arg10[%c0_5, %c0_6] : memref<1x128xf32, #tpu.memory_space<vmem>>, vector<1x128xf32>
      %15 = vector.broadcast %14 : vector<1x128xf32> to vector<64x128xf32>
      %16 = arith.addf %13, %15 : vector<64x128xf32>
      %cst = arith.constant 0.000000e+00 : f32
      %17 = vector.broadcast %cst : f32 to vector<64x128xf32>
      %18 = arith.maximumf %16, %17 : vector<64x128xf32>
      %19 = tpu.transpose %18, [1, 0] : vector<64x128xf32> -> vector<128x64xf32>
      %20 = vector.shape_cast %19 : vector<128x64xf32> to vector<8x16x64xf32>
      %c0_7 = arith.constant 0 : index
      %c0_8 = arith.constant 0 : index
      %c0_9 = arith.constant 0 : index
      %c0_10 = arith.constant 0 : index
      %21 = vector.load %arg11[%c0_7, %c0_8, %c0_9, %c0_10] : memref<1x8x16x64xf32, #tpu.memory_space<vmem>>, vector<1x8x16x64xf32>
      %22 = vector.shape_cast %21 : vector<1x8x16x64xf32> to vector<8x16x64xf32>
      %23 = vector.shape_cast %20 : vector<8x16x64xf32> to vector<1x8x16x64xf32>
      tpu.vector_store %arg11[%c0_7, %c0_8, %c0_9, %c0_10], %23 {strides = array<i32>} : memref<1x8x16x64xf32, #tpu.memory_space<vmem>>, vector<1x8x16x64xf32>,
    } else {
    }
    return
  }
  func.func @transform_0(%arg0: i32, %arg1: i32, %arg2: i32, %arg3: i32, %arg4: memref<1xi32, #tpu.memory_space<smem>>, %arg5: memref<8xi32, #tpu.memory_space<smem>>) -> (i32, i32, i32, i32) {
    %c0_i32 = arith.constant 0 : i32
    %c0_i32_0 = arith.constant 0 : i32
    %c0_i32_1 = arith.constant 0 : i32
    return %arg1, %arg3, %c0_i32, %c0_i32_0 : i32, i32, i32, i32
  }
  func.func @transform_1(%arg0: i32, %arg1: i32, %arg2: i32, %arg3: i32, %arg4: memref<1xi32, #tpu.memory_space<smem>>, %arg5: memref<8xi32, #tpu.memory_space<smem>>) -> (i32, i32, i32, i32) {
    %0 = arith.index_cast %arg1 : i32 to index
    %1 = memref.load %arg4[%0] : memref<1xi32, #tpu.memory_space<smem>>
    %2 = arith.addi %1, %arg3 : i32
    %c0_i32 = arith.constant 0 : i32
    %c0_i32_0 = arith.constant 0 : i32
    %c0_i32_1 = arith.constant 0 : i32
    return %arg0, %2, %c0_i32, %c0_i32_0 : i32, i32, i32, i32
  }
  func.func @transform_2(%arg0: i32, %arg1: i32, %arg2: i32, %arg3: i32, %arg4: memref<1xi32, #tpu.memory_space<smem>>, %arg5: memref<8xi32, #tpu.memory_space<smem>>) -> (i32, i32, i32) {
    %c0_i32 = arith.constant 0 : i32
    %c0_i32_0 = arith.constant 0 : i32
    %c0_i32_1 = arith.constant 0 : i32
    return %arg2, %c0_i32, %c0_i32_0 : i32, i32, i32
  }
  func.func @transform_3(%arg0: i32, %arg1: i32, %arg2: i32, %arg3: i32, %arg4: memref<1xi32, #tpu.memory_space<smem>>, %arg5: memref<8xi32, #tpu.memory_space<smem>>) -> (i32, i32, i32) {
    %c0_i32 = arith.constant 0 : i32
    %c0_i32_0 = arith.constant 0 : i32
    %c0_i32_1 = arith.constant 0 : i32
    %c0_i32_2 = arith.constant 0 : i32
    return %c0_i32, %c0_i32_0, %c0_i32_1 : i32, i32, i32
  }
  func.func @transform_4(%arg0: i32, %arg1: i32, %arg2: i32, %arg3: i32, %arg4: memref<1xi32, #tpu.memory_space<smem>>, %arg5: memref<8xi32, #tpu.memory_space<smem>>) -> (i32, i32) {
    %c0_i32 = arith.constant 0 : i32
    %c0_i32_0 = arith.constant 0 : i32
    %c0_i32_1 = arith.constant 0 : i32
    return %c0_i32, %c0_i32_0 : i32, i32
  }
  func.func @transform_5(%arg0: i32, %arg1: i32, %arg2: i32, %arg3: i32, %arg4: memref<1xi32, #tpu.memory_space<smem>>, %arg5: memref<8xi32, #tpu.memory_space<smem>>) -> (i32, i32, i32, i32) {
    %c0_i32 = arith.constant 0 : i32
    %c0_i32_0 = arith.constant 0 : i32
    return %arg0, %c0_i32, %arg1, %arg2 : i32, i32, i32, i32
  }
}

</mosaic_0001>

<bundles_post_ra>
// kernel: tpu_custom_call.1
= control target key start
LH: loop header
LB: loop body
LE: loop exit
PB: predicated region body
PF: predicated region fallthrough
CT: control target
= control target key end

     0   :  { %s1850_s29 = smov [#allocation6]   ;;  %s2675_s0 = inlined_call_operand.<no memory space> [shape: s32[1], index: 0, kind: input, shape index: {}]   ;;  %s2676_s1 = inlined_call_operand.vmem [shape: s32[8], index: 1, kind: input, shape index: {}]   ;;  %s2677_s2 = inlined_call_operand.vmem [shape: f32[1,8,3,128], index: 2, kind: input, shape index: {}]   ;;  %s2678_s3 = inlined_call_operand.vmem [shape: f32[2,8,4,40], index: 3, kind: input, shape index: {}]   ;;  %s2679_s4 = inlined_call_operand.vmem [shape: f32[1,10,4], index: 4, kind: input, shape index: {}]   ;;  %s2680_s5 = inlined_call_operand.hbm [shape: f32[3,36,128], index: 5, kind: input, shape index: {}]   ;;  %s2681_s6 = inlined_call_operand.vmem [shape: f32[1,128], index: 6, kind: input, shape index: {}]   ;;  %s2682_s7 = inlined_call_operand.hbm [shape: f32[2,8,16,64], index: 7, kind: output, shape index: {}]  }
   0x1   :  { %2686 = sst [smem:[#allocation17_spill]] %s2680_s5  ;;  %s14_s28 = sshll.u32 %s2676_s1, 4  ;;  %s15_s28 = int_to_ptr.vmem [resolvable:$true] %s14_s28 }
   0x2   :  { %12 = sst [smem:[#allocation5]] %s2675_s0 }
   0x3   :  { %17 = dma.vmem_to_smem %s15_s28, 16, %s1850_s29, [#allocation4] }
   0x4   :  { %1808 = dma.done.wait [#allocation4], 16 }
   0x5   :  { %1809 = vsyncadd [#allocation4], 4294967280 }
   0x6   :  { %20 = sfence }
   0x7   :  { %21 = vsyncpa [#allocation8], 0 }
   0x8   :  { %22 = vsyncpa [#allocation9], 0 }
   0x9   :  { %24 = vsyncpa [#allocation9 + $0x1], 0  ;;  %s1922_s30 = smov 0   ;;  %s1924_s8 = smov 0  }
   0xa   :  { %s1926_s9 = smov 0   ;;  %s1928_s0 = smov 0  }
   0xb   :  { %s1930_s10 = smov 0   ;;  %s1932_s1 = smov 0  }
   0xc   :  { %s1934_s11 = smov 0   ;;  %s1936_s12 = smov 0  }
   0xd LB: > { %2687 = sst [smem:[#allocation14_spill]] %s1844_s11  ;;  %s1554_s13 = sadd.s32 4294967295, %s1848_s12   ;;  %s1848_s12 = sphi %s1936_s12, %s30_s12   ;;  %s1844_s11 = sphi %s1934_s11, %s2697_s11   ;;  %s1840_s1 = sphi %s1932_s1, %s2702_s1   ;;  %s1836_s10 = sphi %s1930_s10, %s2695_s10   ;;  %s1832_s0 = sphi %s1928_s0, %s2701_s0   ;;  %s1828_s9 = sphi %s1926_s9, %s2700_s9   ;;  %s1824_s8 = sphi %s1924_s8, %s2699_s8   ;;  %s1820_s30 = sphi %s1922_s30, %s2698_s30  }
   0xe   : > { %s1555_s14 = sadd.s32 4294967294, %s1848_s12   ;;  %s45_s15 = sadd.s32 1, %s1840_s1 }
   0xf   : > { %s56_s16 = sadd.s32 1, %s1844_s11  ;;  %p46_p0 = scmp.ge.s32.totalorder %s45_s15, 8 }
  0x10   : > { %s195_s17 = sadd.s32 1, %s1828_s9  ;;  %p205_p1 = scmp.ne.s32.totalorder %s1828_s9, %s1824_s8 }
  0x11   : > { %p206_p2 = scmp.eq.s32.totalorder %s1554_s13, 15  ;;  %s2704_s15 = smov (%p46_p0, %s45_s15), 0 }
  0x12   : > { %2688 = sst [smem:[#allocation15_spill]] %s2704_s15  ;;  %s2706_s16 = smov (!%p46_p0, %s56_s16), %s1844_s11 }
  0x13   : > { %p1972_p3 = por %p206_p2, %p205_p1  ;;  %p211_p4 = scmp.ne.s32.totalorder %s1824_s8, %s1820_s30 }
  0x14   : > { %p58_p5 = scmp.ge.s32.totalorder %s2706_s16, 2  ;;  %p212_p6 = scmp.eq.s32.totalorder %s1555_s14, 15 }
  0x15   : > { %p1556_p7 = scmp.ge.s32.totalorder %s1848_s12, 1  ;;  %p219_p8 = scmp.lt.s32.totalorder %s1848_s12, 17 }
  0x16   : > { %s2708_s16 = smov (%p58_p5, %s2706_s16), 0  ;;  %p1982_p9 = por %p212_p6, %p211_p4 }
  0x17   : > { %2690 = sst [smem:[#allocation16_spill]] %s2708_s16  ;;  %p1986_p10 = pnand %p1556_p7, %p219_p8 }
  0x18   : > { %s188_s21 = ssub.s32 %s1844_s11, %s2708_s16  ;;  %p1611_p13 = scmp.eq.s32.totalorder %s1554_s13, 0 }
  0x19   : > { %p193_p11 = scmp.eq.s32.totalorder %s188_s21, 0  ;;  %p1603_p12 = pneg %p1986_p10 }
  0x1a   : > { %s2693_s5 = sld [smem:[#allocation17_spill]]  ;;  %s1851_s26 = smov [#allocation7]  }
  0x1b   : > { %s1998_s25 = scalar_select %p193_p11, %s1828_s9, %s195_s17  }
  0x1c   : > { %s240_s27 = sshll.u32 %s1851_s26, 4  ;;  %p1604_p0 = pnand %p1611_p13, %p1603_p12  ;;  %s241_s27 = int_to_ptr.vmem [resolvable:$true] %s240_s27 }
  0x1d   : > { %s1852_s28 = smov 128   ;;  %s1853_s29 = smov 8  }
  0x1e   : > { %285 = sbr.rel (%p1986_p10) target bundleno = 1198 (0x4ae), region = 40 }
  0x20   : > { %s238_s24 = sshll.u32 %s2693_s5, 4  ;;  %s239_s24 = int_to_ptr.hbm [resolvable:$true] %s238_s24 }
  0x21   : > { %1606 = dma.hbm_to_vmem [thread:$0]  (!%p1604_p0), %s239_s24, 1920, %s241_s27, [#allocation8], %s1852_s28, %s1852_s28, %s1853_s29  }
  0x23   : > { %1811 = dma.done.wait (%p1611_p13), [#allocation8], 1920  }
  0x24   : > { %1813 = vsyncadd (%p1611_p13), [#allocation8], 4294965376  ;;  %p342_p1 = scmp.lt.s32.totalorder %s1836_s10, 1  ;;  %s2685_s13 = sand.u32 1, %s1824_s8  }
  0x25   : > { %s340_s14 = sld [smem:[#allocation5]]  ;;  %s1562_s17 = sshll.u32 %s2685_s13, 7 }
  0x26   : > { %p334_p2 = scmp.lt.s32.totalorder %s1832_s0, 7  ;;  %s2018_s13 = scalar_lea.vmem [#allocation10], %s1562_s17 }
  0x27   : > { %s343_s21 = scalar_select %p342_p1, %s1836_s10, 1 }
  0x28   : > { %s335_s22 = scalar_select %p334_p2, %s1832_s0, 7 }
  0x29   : > { %s1564_s28 = sshll.u32 %s343_s21, 3  ;;  %p1566_p5 = scmp.ne.s32.totalorder %s1832_s0, 0 }
  0x2a   : > { %s1563_s20 = sshll.u32 %s335_s22, 2 }
  0x2b   : > { %s341_s23 = sadd.s32 %s1832_s0, %s340_s14  ;;  %s2013_s27 = scalar_lea.vmem %s2677_s2, %s1563_s20 }
  0x2c   : > { %p344_p4 = scmp.lt.s32.totalorder %s341_s23, 7 }
  0x2d   : > { %361 = sbr.rel (%p1566_p5) target bundleno = 59 (0x3b), region = 48 }
  0x2e   : > { %s2710_s23 = smov (!%p344_p4, %s341_s23), 7 }
  0x2f   : > { %s347_s29 = sadd.s32 %s1564_s28, %s2710_s23 }
  0x30   : > { %s1565_s5 = sshll.u32 %s347_s29, 2 }
  0x31   : > { %s349_s11 = scalar_lea.vmem %s2678_s3, %s1565_s5 }
  0x32   : > { %v1854_v0 = vmov 0.0  }
  0x33   : > { %362 = vst [vmem:[#allocation2 + $0x30] sm:$0xff] %v1854_v0 }
  0x34   : > { %363 = vst [vmem:[#allocation2] sm:$0xff] %v1854_v0 }
  0x35   : > { %364 = vst [vmem:[#allocation2 + $0x18] sm:$0xff] %v1854_v0 }
  0x36   : > { %365 = vst [vmem:[#allocation2 + $0x10] sm:$0xff] %v1854_v0 }
  0x37   : > { %366 = vst [vmem:[#allocation2 + $0x8] sm:$0xff] %v1854_v0 }
  0x38   : > { %367 = vst [vmem:[#allocation2 + $0x20] sm:$0xff] %v1854_v0 }
  0x39   : > { %368 = vst [vmem:[#allocation2 + $0x28] sm:$0xff] %v1854_v0 }
  0x3a   : > { %369 = vst [vmem:[#allocation2 + $0x38] sm:$0xff] %v1854_v0 }
  0x3b PF: > { %s372_s14 = sld [smem:[#allocation6 + %s1832_s0]] }
  0x41   : > { %p1567_p6 = scmp.eq.s32.totalorder %s372_s14, 0 }
  0x42   : > { %s1855_s21 = smov (!%p1567_p6), 116   ;;  %s1857_s22 = smov (!%p1567_p6), 124  }
  0x43   : > { %376 = sbr.rel (%p1567_p6) target bundleno = 884 (0x374), region = 52  ;;  %s1858_s23 = smov (!%p1567_p6), 108  }
  0x44   : > { %s1859_s20 = smov (!%p1567_p6), 104   ;;  %s1860_s24 = smov (!%p1567_p6), 112  }
  0x45   : > { %s1861_s26 = smov (!%p1567_p6), 96   ;;  %s1862_s28 = smov (!%p1567_p6), 92  }
  0x46   : > { %s1863_s29 = smov (!%p1567_p6), 100   ;;  %s1866_s14 = smov (!%p1567_p6), 4  }
  0x47   : > { %s1867_s5 = smov (!%p1567_p6), 8   ;;  %s1868_s15 = smov (!%p1567_p6), 16  }
  0x48   : > { %v377_v1 = vld [vmem:[%s349_s11] sm:$0xf]  ;;  %vm387_vm0 = vcmask 1043456   ;;  %vm380_vm1 = vcmask 31744   ;;  %v379_v3 = vld [vmem:[%s2679_s4 + $0x8] sm:$0x3] }
  0x49   : > { %v378_v2 = vld [vmem:[%s2679_s4] sm:$0xff]  ;;  %1568 = vmatpush.msk.msra.mxu0 %vm387_vm0, %v377_v1  ;;  %s1856_s11 = smov 120   ;;  %v1864_v8 = vmov 1983009808   ;;  %vm469_vm2 = vcmask 1047556   ;;  %s1869_s16 = smov 20  }
  0x4a   : > { %1569 = vmatmul.msk.f32.vlgmr.msra.gmra.mxu0 %vm380_vm1, %v378_v2  ;;  %v474_v9 = vunpack.c.l.s4 %v1864_v8  ;;  %v1865_v26 = vmov 1934713408   ;;  %s1870_s17 = smov 32   ;;  %vm757_vm3 = vcmask 57376   ;;  %vm755_vm4 = vcmask 64545  }
  0x4b   : > { %v522_v27 = vunpack.c.l.s4 %v1865_v26  ;;  %vm821_vm5 = vcmask 97346   ;;  %vm823_vm6 = vcmask 91200   ;;  %vm864_vm7 = vcmask 130144  }
  0x4c   : > { %v2043_v17 = vunpack.c.0.s8 %v474_v9  ;;  %vm924_vm8 = vcmask 155776   ;;  %vm922_vm9 = vcmask 162945   ;;  %vm988_vm10 = vcmask 195746  }
  0x4d   : > { %v2057_v37 = vunpack.c.0.s8 %v522_v27  ;;  %vm990_vm11 = vcmask 189600   ;;  %vm1031_vm12 = vcmask 228544   ;;  %vm1089_vm13 = vcmask 261345  }
  0x4e   : > { %vm1155_vm14 = vcmask 294146   ;;  %vm1091_vm15 = vcmask 254176  }
  0x52   : > { %1570 = vmatmul.msk.f32.gmra.mxu0 %vm380_vm1, %v379_v3 }
  0xc7   : > { %v408_v4 = vpop.f32.mrf.mxu0 }
  0xc8   : > { %428 = vrot.lane.b32.xlu2 %v408_v4, %s1855_s21  ;;  %422 = vrot.lane.b32.xlu1 %v408_v4, %s1856_s11  ;;  %v471_v12 = vrot.slane %v408_v4, 4 }
  0xc9   : > { %416 = vrot.lane.b32.xlu0 %v408_v4, %s1857_s22 }
  0xcf   : > { %v2031_v5 = vpop.f32.mrf.mxu0 }
  0xd0   : > { %440 = vrot.lane.b32.xlu2 %v408_v4, %s1858_s23  ;;  %446 = vrot.lane.b32.xlu1 %v408_v4, %s1859_s20 }
  0xd1   : > { %434 = vrot.lane.b32.xlu0 %v408_v4, %s1860_s24 }
  0xd8   : > { %458 = vrot.lane.b32.xlu2 %v408_v4, %s1861_s26  ;;  %463 = vrot.lane.b32.xlu1 %v408_v4, %s1862_s28 }
  0xd9   : > { %452 = vrot.lane.b32.xlu0 %v408_v4, %s1863_s29 }
  0xe0   : > { %424 = vrot.lane.b32.xlu1 %v2031_v5, %s1856_s11  ;;  %430 = vrot.lane.b32.xlu2 %v2031_v5, %s1855_s21  ;;  %s1871_s21 = smov 28   ;;  %s1872_s11 = smov 12  }
  0xe1   : > { %418 = vrot.lane.b32.xlu0 %v2031_v5, %s1857_s22  ;;  %s1873_s22 = smov 24  }
  0xe8   : > { %436 = vrot.lane.b32.xlu1 %v2031_v5, %s1860_s24  ;;  %448 = vrot.lane.b32.xlu2 %v2031_v5, %s1859_s20 }
  0xe9   : > { %442 = vrot.lane.b32.xlu0 %v2031_v5, %s1858_s23 }
  0xf0   : > { %454 = vrot.lane.b32.xlu1 %v2031_v5, %s1863_s29  ;;  %465 = vrot.lane.b32.xlu2 %v2031_v5, %s1862_s28 }
  0xf1   : > { %460 = vrot.lane.b32.xlu0 %v2031_v5, %s1861_s26 }
 0x122   : > { %v429_v6 = vpop.permute.xlu2 %428 }
 0x123   : > { %v481_v16 = vrot.slane %v429_v6, 4 }
 0x12a   : > { %v441_v7 = vpop.permute.xlu2 %440 }
 0x12b   : > { %v507_v42 = vrot.slane %v441_v7, 4 }
 0x132   : > { %v2047_v20 = vpop.permute.xlu2 %458 }
 0x133   : > { %v586_v35 = vperm.slane %v2047_v20, %v2043_v17  ;;  %v581_v46 = vrot.slane %v2047_v20, 4 }
 0x135   : > { %v603_v47 = vrot.slane %v586_v35, 4 }
 0x13a   : > { %v423_v10 = vpop.permute.xlu1 %422  ;;  %v2060_v40 = vpop.permute.xlu2 %430 }
 0x13b   : > { %v468_v11 = vrot.slane %v423_v10, 4  ;;  %v417_v13 = vpop.permute.xlu0 %416  ;;  %v472_v15 = vsel %vm469_vm2, %v423_v10, %v471_v12  ;;  %v639_v50 = vrot.slane %v2060_v40, 4 }
 0x13c   : > { %v483_v14 = vrot.slane %v417_v13, 4  ;;  %v480_v21 = vperm.slane %v472_v15, %v2043_v17  ;;  %v482_v22 = vsel %vm469_vm2, %v481_v16, %v417_v13 }
 0x13d   : > { %v470_v18 = vsel %vm469_vm2, %v468_v11, %v408_v4  ;;  %v488_v28 = vperm.slane %v482_v22, %v2043_v17 }
 0x13e   : > { %v484_v19 = vsel %vm469_vm2, %v429_v6, %v483_v14  ;;  %v476_v23 = vperm.slane %v470_v18, %v2043_v17  ;;  %v531_v31 = vrot.slane %v480_v21, 4 }
 0x13f   : > { %v492_v24 = vperm.slane %v484_v19, %v2043_v17  ;;  %v517_v38 = vrot.slane %v488_v28, 4 }
 0x140   : > { %v519_v33 = vrot.slane %v476_v23, 4 }
 0x141   : > { %v529_v34 = vrot.slane %v492_v24, 4  ;;  %v532_v41 = vsel %vm469_vm2, %v492_v24, %v531_v31  ;;  %v518_v55 = vsel %vm469_vm2, %v517_v38, %v476_v23 }
 0x142   : > { %v447_v25 = vpop.permute.xlu1 %446  ;;  %v520_v43 = vsel %vm469_vm2, %v488_v28, %v519_v33  ;;  %v540_v51 = vperm.slane %v532_v41, %v2057_v37  ;;  %v524_v12 = vperm.slane %v518_v55, %v2057_v37  ;;  %v582_v33 = vsel %vm469_vm2, 0.0, %v581_v46 }
 0x143   : > { %v493_v29 = vrot.slane %v447_v25, 4  ;;  %v435_v30 = vpop.permute.xlu0 %434  ;;  %v530_v44 = vsel %vm469_vm2, %v529_v34, %v480_v21  ;;  %v528_v56 = vperm.slane %v520_v43, %v2057_v37 }
 0x144   : > { %v495_v32 = vrot.slane %v435_v30, 4  ;;  %v536_v57 = vperm.slane %v530_v44, %v2057_v37  ;;  %v579_v10 = vrot.slane %v540_v51, 4 }
 0x145   : > { %v494_v39 = vsel %vm469_vm2, %v493_v29, %v435_v30  ;;  %v571_v13 = vrot.slane %v528_v56, 4 }
 0x146   : > { %v496_v36 = vsel %vm469_vm2, %v447_v25, %v495_v32  ;;  %v2068_v48 = vperm.slane %v494_v39, %v2043_v17  ;;  %v575_v14 = vrot.slane %v536_v57, 4  ;;  %v449_v32 = vpop.permute.xlu2 %448 }
 0x147   : > { %v504_v45 = vperm.slane %v496_v36, %v2043_v17  ;;  %v645_v43 = vrot.slane %v449_v32, 4 }
 0x148   : > { %v543_v0 = vrot.slane %v2068_v48, 4 }
 0x149   : > { %v555_v60 = vrot.slane %v504_v45, 4 }
 0x14a   : > { %v464_v49 = vpop.permute.xlu1 %463 }
 0x14b   : > { %v591_v52 = vrot.slane %v464_v49, 4  ;;  %v596_v53 = vperm.slane %v464_v49, %v2043_v17  ;;  %v453_v54 = vpop.permute.xlu0 %452  ;;  %v590_v49 = vperm.slane %v582_v33, %v2043_v17 }
 0x14c   : > { %v505_v58 = vrot.slane %v453_v54, 4  ;;  %v508_v59 = vsel %vm469_vm2, %v453_v54, %v507_v42 }
 0x14d   : > { %v601_v61 = vrot.slane %v596_v53, 4  ;;  %v604_v62 = vsel %vm469_vm2, %v596_v53, %v603_v47  ;;  %v516_v63 = vperm.slane %v508_v59, %v2043_v17  ;;  %v592_v1 = vsel %vm469_vm2, 0.0, %v591_v52 }
 0x14e   : > { %v2082_v2 = vperm.slane %v604_v62, %v2057_v37  ;;  %v506_v3 = vsel %vm469_vm2, %v505_v58, %v441_v7  ;;  %v2098_v18 = vperm.slane %v592_v1, %v2043_v17  ;;  %v567_v47 = vrot.slane %v524_v12, 4 }
 0x14f   : > { %v512_v4 = vperm.slane %v506_v3, %v2043_v17  ;;  %v553_v6 = vrot.slane %v516_v63, 4  ;;  %v556_v8 = vsel %vm469_vm2, %v516_v63, %v555_v60  ;;  %v602_v9 = vsel %vm469_vm2, %v601_v61, %v586_v35 }
 0x150   : > { %v564_v11 = vperm.slane %v556_v8, %v2057_v37  ;;  %717 = vrot.lane.b32.xlu2 %v2082_v2, %s1866_s14  ;;  %783 = vrot.lane.b32.xlu0 %v2082_v2, %s1867_s5  ;;  %v608_v7 = vperm.slane %v602_v9, %v2057_v37  ;;  %v613_v42 = vrot.slane %v2098_v18, 4  ;;  %v627_v55 = vrot.slane %v2082_v2, 4 }
 0x151   : > { %v544_v15 = vsel %vm469_vm2, %v512_v4, %v543_v0  ;;  %v554_v16 = vsel %vm469_vm2, %v553_v6, %v504_v45  ;;  %v541_v23 = vrot.slane %v512_v4, 4  ;;  %v615_v61 = vrot.slane %v590_v49, 4 }
 0x152   : > { %v552_v19 = vperm.slane %v544_v15, %v2057_v37  ;;  %v560_v20 = vperm.slane %v554_v16, %v2057_v37  ;;  %v577_v21 = vrot.slane %v564_v11, 4  ;;  %709 = vrot.lane.b32.xlu1 %v608_v7, %s1866_s14  ;;  %v425_v22 = vpop.permute.xlu1 %424  ;;  %v2104_v24 = vsel %vm469_vm2, %v564_v11, %v579_v10 }
 0x153   : > { %v633_v25 = vrot.slane %v425_v22, 4  ;;  %v419_v26 = vpop.permute.xlu0 %418  ;;  %v625_v27 = vrot.slane %v608_v7, 4  ;;  %690 = vst.msk [vmem:[#allocation3 + $0x38] sm:$0xff] %vm380_vm1, %v2104_v24  ;;  %v542_v44 = vsel %vm469_vm2, %v541_v23, %v2068_v48  ;;  %v614_v53 = vsel %vm469_vm2, %v613_v42, %v590_v49 }
 0x154   : > { %v569_v28 = vrot.slane %v552_v19, 4  ;;  %v2107_v29 = vsel %vm469_vm2, %v552_v19, %v571_v13  ;;  %v573_v30 = vrot.slane %v560_v20, 4  ;;  %v2110_v31 = vsel %vm469_vm2, %v560_v20, %v575_v14  ;;  %v466_v13 = vpop.permute.xlu2 %465 }
 0x155   : > { %v2116_v34 = vsel %vm469_vm2, %v577_v21, %v540_v51  ;;  %686 = vst.msk [vmem:[#allocation3 + $0x18] sm:$0xff] %vm380_vm1, %v2107_v29  ;;  %v634_v35 = vsel %vm469_vm2, %v633_v25, %v2031_v5  ;;  %v640_v36 = vsel %vm469_vm2, %v639_v50, %v419_v26  ;;  %v626_v5 = vsel %vm469_vm2, 0.0, %v625_v27 }
 0x156   : > { %v2124_v38 = vsel %vm469_vm2, %v569_v28, %v528_v56  ;;  %v2127_v39 = vsel %vm469_vm2, %v573_v30, %v536_v57  ;;  %688 = vst.msk [vmem:[#allocation3 + $0x28] sm:$0xff] %vm380_vm1, %v2110_v31  ;;  %v638_v40 = vperm.slane %v634_v35, %v2043_v17  ;;  %v644_v41 = vperm.slane %v640_v36, %v2043_v17 }
 0x157   : > { %685 = vst.msk [vmem:[#allocation3 + $0x10] sm:$0xff] %vm380_vm1, %v2124_v38  ;;  %v548_v46 = vperm.slane %v542_v44, %v2057_v37  ;;  %v2166_v59 = vperm.slane %v614_v53, %v2057_v37  ;;  %v2169_v60 = vsel %vm469_vm2, 0.0, %v627_v55  ;;  %v616_v0 = vsel %vm469_vm2, %v2098_v18, %v615_v61 }
 0x158   : > { %687 = vst.msk [vmem:[#allocation3 + $0x20] sm:$0xff] %vm380_vm1, %v2127_v39  ;;  %v657_v45 = vrot.slane %v644_v41, 4  ;;  %775 = vrot.lane.b32.xlu2 %v608_v7, %s1867_s5  ;;  %713 = vrot.lane.b32.xlu0 %v626_v5, %s1866_s14  ;;  %v2181_v4 = vperm.slane %v616_v0, %v2057_v37  ;;  %v675_v14 = vrot.slane %v466_v13, 4 }
 0x159   : > { %689 = vst.msk [vmem:[#allocation3 + $0x30] sm:$0xff] %vm380_vm1, %v2116_v34  ;;  %v565_v51 = vrot.slane %v548_v46, 4  ;;  %v2151_v52 = vsel %vm469_vm2, %v548_v46, %v567_v47  ;;  %v629_v23 = vrot.slane %v2166_v59, 4 }
 0x15a   : > { %v658_v50 = vsel %vm469_vm2, %v657_v45, %v638_v40  ;;  %880 = vrot.lane.b32.xlu1 %v2082_v2, %s1868_s15  ;;  %v437_v48 = vpop.permute.xlu1 %436  ;;  %684 = vst.msk [vmem:[#allocation3 + $0x8] sm:$0xff] %vm380_vm1, %v2151_v52  ;;  %v631_v19 = vrot.slane %v2181_v4, 4 }
 0x15b   : > { %v662_v54 = vperm.slane %v658_v50, %v2057_v37  ;;  %v646_v56 = vsel %vm469_vm2, %v645_v43, %v437_v48  ;;  %v2161_v58 = vsel %vm469_vm2, %v565_v51, %v524_v12  ;;  %v443_v63 = vpop.permute.xlu0 %442 }
 0x15c   : > { %v650_v57 = vperm.slane %v646_v56, %v2043_v17  ;;  %683 = vst.msk [vmem:[#allocation3] sm:$0xff] %vm380_vm1, %v2161_v58  ;;  %v2250_v20 = vsel %vm469_vm2, 0.0, %v631_v19  ;;  %vm1235_vm1 = vcmask 293888  }
 0x15d   : > { %v671_v11 = vrot.slane %v662_v54, 4 }
 0x160   : > { %787 = vrot.lane.b32.xlu2 %v2169_v60, %s1867_s5  ;;  %725 = vrot.lane.b32.xlu0 %v2166_v59, %s1866_s14 }
 0x162   : > { %721 = vrot.lane.b32.xlu1 %v2169_v60, %s1866_s14  ;;  %v455_v62 = vpop.permute.xlu1 %454 }
 0x163   : > { %v651_v1 = vrot.slane %v455_v62, 4  ;;  %v461_v15 = vpop.permute.xlu0 %460 }
 0x164   : > { %v676_v16 = vsel %vm469_vm2, %v675_v14, %v461_v15 }
 0x165   : > { %v652_v3 = vsel %vm469_vm2, %v651_v1, %v443_v63  ;;  %v2204_v18 = vperm.slane %v676_v16, %v2057_v37 }
 0x166   : > { %v656_v6 = vperm.slane %v652_v3, %v2043_v17 }
 0x168   : > { %v663_v8 = vrot.slane %v656_v6, 4  ;;  %799 = vrot.lane.b32.xlu2 %v2181_v4, %s1867_s5  ;;  %884 = vrot.lane.b32.xlu0 %v2169_v60, %s1868_s15 }
 0x16a   : > { %v664_v9 = vsel %vm469_vm2, %v663_v8, %v650_v57  ;;  %733 = vrot.lane.b32.xlu1 %v2181_v4, %s1866_s14 }
 0x16b   : > { %v668_v10 = vperm.slane %v664_v9, %v2057_v37 }
 0x16d   : > { %v669_v7 = vrot.slane %v668_v10, 4  ;;  %v2193_v12 = vsel %vm469_vm2, %v668_v10, %v671_v11 }
 0x16f   : > { %v2196_v17 = vsel %vm469_vm2, %v669_v7, %v662_v54 }
 0x170   : > { %876 = vrot.lane.b32.xlu2 %v626_v5, %s1868_s15  ;;  %962 = vrot.lane.b32.xlu0 %v2181_v4, %s1869_s16 }
 0x172   : > { %779 = vrot.lane.b32.xlu1 %v626_v5, %s1867_s5 }
 0x178   : > { %896 = vrot.lane.b32.xlu2 %v2181_v4, %s1868_s15  ;;  %888 = vrot.lane.b32.xlu0 %v2166_v59, %s1868_s15 }
 0x17a   : > { %791 = vrot.lane.b32.xlu1 %v2166_v59, %s1867_s5 }
 0x180   : > { %1117 = vrot.lane.b32.xlu2 %v2166_v59, %s1870_s17  ;;  %942 = vrot.lane.b32.xlu0 %v626_v5, %s1869_s16 }
 0x182   : > { %950 = vrot.lane.b32.xlu1 %v2169_v60, %s1869_s16 }
 0x188   : > { %735 = vrot.lane.b32.xlu2 %v2104_v24, %s1866_s14  ;;  %801 = vrot.lane.b32.xlu0 %v2104_v24, %s1867_s5 }
 0x18a   : > { %1051 = vrot.lane.b32.xlu1 %v2166_v59, %s1871_s21 }
 0x190   : > { %852 = vrot.lane.b32.xlu2 %v2104_v24, %s1872_s11  ;;  %1127 = vrot.lane.b32.xlu0 %v2104_v24, %s1870_s17 }
 0x192   : > { %954 = vrot.lane.b32.xlu1 %v2166_v59, %s1869_s16 }
 0x198   : > { %1017 = vrot.lane.b32.xlu2 %v2104_v24, %s1873_s22  ;;  %707 = vrot.lane.b32.xlu0 %v2161_v58, %s1866_s14 }
 0x19a   : > { %898 = vrot.lane.b32.xlu1 %v2104_v24, %s1868_s15 }
 0x1a0   : > { %1061 = vrot.lane.b32.xlu2 %v2104_v24, %s1871_s21  ;;  %719 = vrot.lane.b32.xlu0 %v2107_v29, %s1866_s14 }
 0x1a2   : > { %715 = vrot.lane.b32.xlu1 %v2124_v38, %s1866_s14 }
 0x1a8   : > { %964 = vrot.lane.b32.xlu2 %v2104_v24, %s1869_s16  ;;  %731 = vrot.lane.b32.xlu0 %v2116_v34, %s1866_s14  ;;  %v2270_v24 = vsel %vm469_vm2, 0.0, %v629_v23 }
 0x1aa   : > { %v718_v37 = vpop.permute.xlu2 %717  ;;  %727 = vrot.lane.b32.xlu1 %v2110_v31, %s1866_s14 }
 0x1ab   : > { %762 = vst.msk [vmem:[#allocation3 + $0x17] sm:$0x1] %vm757_vm3, %v718_v37 }
 0x1b0   : > { %711 = vrot.lane.b32.xlu2 %v2151_v52, %s1866_s14  ;;  %737 = vrot.lane.b32.xlu0 %v2250_v20, %s1866_s14 }
 0x1b2   : > { %v2256_v21 = vpop.permute.xlu2 %775  ;;  %773 = vrot.lane.b32.xlu1 %v2161_v58, %s1867_s5 }
 0x1b8   : > { %723 = vrot.lane.b32.xlu2 %v2127_v39, %s1866_s14  ;;  %777 = vrot.lane.b32.xlu0 %v2151_v52, %s1867_s5 }
 0x1ba   : > { %v2264_v22 = vpop.permute.xlu2 %787  ;;  %785 = vrot.lane.b32.xlu1 %v2107_v29, %s1867_s5 }
 0x1c0   : > { %729 = vrot.lane.b32.xlu2 %v2270_v24, %s1866_s14  ;;  %789 = vrot.lane.b32.xlu0 %v2127_v39, %s1867_s5 }
 0x1c2   : > { %v2276_v25 = vpop.permute.xlu2 %799  ;;  %797 = vrot.lane.b32.xlu1 %v2116_v34, %s1867_s5  ;;  %v2280_v26 = vpop.permute.xlu0 %783 }
 0x1c4   : > { %v710_v27 = vpop.permute.xlu1 %709 }
 0x1c5   : > { %758 = vst.msk [vmem:[#allocation3 + $0x7] sm:$0x1] %vm757_vm3, %v710_v27  ;;  %v1190_v27 = vld [vmem:[#allocation7 + $0x48] sm:$0xf] }
 0x1c8   : > { %781 = vrot.lane.b32.xlu2 %v2124_v38, %s1867_s5  ;;  %795 = vrot.lane.b32.xlu0 %v2270_v24, %s1867_s5 }
 0x1ca   : > { %v2287_v28 = vpop.permute.xlu2 %876  ;;  %803 = vrot.lane.b32.xlu1 %v2250_v20, %s1867_s5  ;;  %v714_v30 = vpop.permute.xlu0 %713 }
 0x1cb   : > { %760 = vst.msk [vmem:[#allocation3 + $0xf] sm:$0x1] %vm757_vm3, %v714_v30 }
 0x1cc   : > { %v2292_v32 = vpop.permute.xlu1 %880 }
 0x1d0   : > { %793 = vrot.lane.b32.xlu2 %v2110_v31, %s1867_s5  ;;  %842 = vrot.lane.b32.xlu0 %v2124_v38, %s1872_s11 }
 0x1d2   : > { %v2298_v33 = vpop.permute.xlu2 %896  ;;  %844 = vrot.lane.b32.xlu1 %v2107_v29, %s1872_s11  ;;  %v726_v35 = vpop.permute.xlu0 %725 }
 0x1d3   : > { %766 = vst.msk [vmem:[#allocation3 + $0x27] sm:$0x1] %vm757_vm3, %v726_v35 }
 0x1d4   : > { %v722_v36 = vpop.permute.xlu1 %721 }
 0x1d5   : > { %764 = vst.msk [vmem:[#allocation3 + $0x1f] sm:$0x1] %vm757_vm3, %v722_v36  ;;  %v1177_v36 = vld [vmem:[#allocation7 + $0x18] sm:$0xff] }
 0x1d8   : > { %840 = vrot.lane.b32.xlu2 %v2151_v52, %s1872_s11  ;;  %848 = vrot.lane.b32.xlu0 %v2110_v31, %s1872_s11 }
 0x1da   : > { %v2308_v40 = vpop.permute.xlu2 %1117  ;;  %850 = vrot.lane.b32.xlu1 %v2116_v34, %s1872_s11  ;;  %v2312_v41 = vpop.permute.xlu0 %884 }
 0x1dc   : > { %v734_v42 = vpop.permute.xlu1 %733 }
 0x1dd   : > { %770 = vst.msk [vmem:[#allocation3 + $0x37] sm:$0x1] %vm757_vm3, %v734_v42  ;;  %v1206_v42 = vld [vmem:[#allocation7 + $0x68] sm:$0xff] }
 0x1e0   : > { %846 = vrot.lane.b32.xlu2 %v2127_v39, %s1872_s11  ;;  %878 = vrot.lane.b32.xlu0 %v2124_v38, %s1868_s15 }
 0x1e2   : > { %v736_v5 = vpop.permute.xlu2 %735  ;;  %874 = vrot.lane.b32.xlu1 %v2151_v52, %s1868_s15  ;;  %v2321_v43 = vpop.permute.xlu0 %962 }
 0x1e3   : > { %771 = vst.msk [vmem:[#allocation3 + $0x37] sm:$0xfe] %vm755_vm4, %v736_v5 }
 0x1e4   : > { %v780_v44 = vpop.permute.xlu1 %779 }
 0x1e8   : > { %882 = vrot.lane.b32.xlu2 %v2107_v29, %s1868_s15  ;;  %948 = vrot.lane.b32.xlu0 %v2107_v29, %s1869_s16 }
 0x1ea   : > { %v2328_v45 = vpop.permute.xlu2 %852  ;;  %894 = vrot.lane.b32.xlu1 %v2116_v34, %s1868_s15  ;;  %v2332_v46 = vpop.permute.xlu0 %888 }
 0x1ec   : > { %v792_v47 = vpop.permute.xlu1 %791 }
 0x1f0   : > { %960 = vrot.lane.b32.xlu2 %v2116_v34, %s1869_s16  ;;  %1049 = vrot.lane.b32.xlu0 %v2127_v39, %s1871_s21 }
 0x1f2   : > { %v2338_v49 = vpop.permute.xlu2 %1017  ;;  %1011 = vrot.lane.b32.xlu1 %v2127_v39, %s1873_s22  ;;  %v2342_v50 = vpop.permute.xlu0 %942 }
 0x1f4   : > { %v2344_v48 = vpop.permute.xlu1 %950 }
 0x1f8   : > { %886 = vrot.lane.b32.xlu2 %v2127_v39, %s1868_s15  ;;  %1063 = vrot.lane.b32.xlu0 %v2250_v20, %s1871_s21 }
 0x1fa   : > { %v2350_v51 = vpop.permute.xlu2 %1061  ;;  %1115 = vrot.lane.b32.xlu1 %v2127_v39, %s1870_s17  ;;  %v802_v53 = vpop.permute.xlu0 %801 }
 0x1fb   : > { %837 = vst.msk [vmem:[#allocation3 + $0x36] sm:$0xfc] %vm821_vm5, %v802_v53 }
 0x1fc   : > { %v2355_v54 = vpop.permute.xlu1 %1051 }
 0x200   : > { %900 = vrot.lane.b32.xlu2 %v2250_v20, %s1868_s15  ;;  %952 = vrot.lane.b32.xlu0 %v2127_v39, %s1869_s16 }
 0x202   : > { %v2361_v55 = vpop.permute.xlu2 %964  ;;  %1129 = vrot.lane.b32.xlu1 %v2250_v20, %s1870_s17  ;;  %v2365_v56 = vpop.permute.xlu0 %1127 }
 0x204   : > { %v2367_v57 = vpop.permute.xlu1 %954 }
 0x208   : > { %1121 = vrot.lane.b32.xlu2 %v2270_v24, %s1870_s17  ;;  %966 = vrot.lane.b32.xlu0 %v2250_v20, %s1869_s16 }
 0x20a   : > { %v712_v58 = vpop.permute.xlu2 %711  ;;  %1013 = vrot.lane.b32.xlu1 %v2110_v31, %s1873_s22  ;;  %v708_v39 = vpop.permute.xlu0 %707 }
 0x20b   : > { %759 = vst.msk [vmem:[#allocation3 + $0x7] sm:$0xfe] %vm755_vm4, %v712_v58 }
 0x20c   : > { %826 = vst.msk [vmem:[#allocation3 + $0xe] sm:$0x3] %vm823_vm6, %v780_v44  ;;  %v899_v59 = vpop.permute.xlu1 %898 }
 0x20d   : > { %756 = vst.msk [vmem:[#allocation3 - $0x1] sm:$0xfe] %vm755_vm4, %v708_v39 }
 0x20e   : > { %824 = vst.msk [vmem:[#allocation3 + $0x6] sm:$0x3] %vm823_vm6, %v2256_v21 }
 0x210   : > { %940 = vrot.lane.b32.xlu2 %v2151_v52, %s1869_s16  ;;  %1053 = vrot.lane.b32.xlu0 %v2110_v31, %s1871_s21 }
 0x212   : > { %v724_v61 = vpop.permute.xlu2 %723  ;;  %1055 = vrot.lane.b32.xlu1 %v2270_v24, %s1871_s21  ;;  %v720_v62 = vpop.permute.xlu0 %719 }
 0x213   : > { %765 = vst.msk [vmem:[#allocation3 + $0x1f] sm:$0xfe] %vm755_vm4, %v724_v61 }
 0x214   : > { %832 = vst.msk [vmem:[#allocation3 + $0x26] sm:$0x3] %vm823_vm6, %v792_v47  ;;  %v716_v63 = vpop.permute.xlu1 %715  ;;  %v1205_v47 = vld [vmem:[#allocation7 + $0x60] sm:$0xff] }
 0x215   : > { %763 = vst.msk [vmem:[#allocation3 + $0x17] sm:$0xfe] %vm755_vm4, %v720_v62  ;;  %v1175_v62 = vld [vmem:[#allocation7 + $0x8] sm:$0xff] }
 0x216   : > { %830 = vst.msk [vmem:[#allocation3 + $0x1e] sm:$0x3] %vm823_vm6, %v2264_v22  ;;  %v1173_v22 = vld [vmem:[%s2013_s27] sm:$0x7] }
 0x217   : > { %761 = vst.msk [vmem:[#allocation3 + $0xf] sm:$0xfe] %vm755_vm4, %v716_v63  ;;  %v1179_v23 = vperm.slane %v1173_v22, 0  ;;  %v1208_v35 = vperm.slane %v1173_v22, 2  ;;  %v1204_v63 = vld [vmem:[#allocation7 + $0x58] sm:$0xff] }
 0x218   : > { %828 = vst.msk [vmem:[#allocation3 + $0x16] sm:$0x3] %vm823_vm6, %v2280_v26  ;;  %892 = vrot.lane.b32.xlu2 %v2270_v24, %s1868_s15  ;;  %1067 = vrot.lane.b32.xlu0 %v2204_v18, %s1871_s21  ;;  %v1178_v26 = vld [vmem:[#allocation7 + $0x20] sm:$0xf] }
 0x219   : > { %v1184_v30 = vmul.f32 %v1179_v23, %v1178_v26  ;;  %v1183_v5 = vmul.f32 %v1179_v23, %v1177_v36  ;;  %v1211_v61 = vmul.f32 %v1208_v35, %v1205_v47 }
 0x21a   : > { %v730_v52 = vpop.permute.xlu2 %729  ;;  %1119 = vrot.lane.b32.xlu1 %v2110_v31, %s1870_s17  ;;  %v732_v0 = vpop.permute.xlu0 %731 }
 0x21b   : > { %768 = vst.msk [vmem:[#allocation3 + $0x2f] sm:$0x1] %vm757_vm3, %v730_v52 }
 0x21c   : > { %769 = vst.msk [vmem:[#allocation3 + $0x2f] sm:$0xfe] %vm755_vm4, %v732_v0  ;;  %v728_v1 = vpop.permute.xlu1 %727  ;;  %v1181_v0 = vmul.f32 %v1179_v23, %v1175_v62 }
 0x21d   : > { %836 = vst.msk [vmem:[#allocation3 + $0x36] sm:$0x3] %vm823_vm6, %v2276_v25 }
 0x21e   : > { %767 = vst.msk [vmem:[#allocation3 + $0x27] sm:$0xfe] %vm755_vm4, %v728_v1 }
 0x220   : > { %1019 = vrot.lane.b32.xlu2 %v2196_v17, %s1873_s22  ;;  %854 = vrot.lane.b32.xlu0 %v2196_v17, %s1872_s11 }
 0x222   : > { %v782_v3 = vpop.permute.xlu2 %781  ;;  %1133 = vrot.lane.b32.xlu1 %v2204_v18, %s1870_s17  ;;  %v738_v6 = vpop.permute.xlu0 %737 }
 0x223   : > { %827 = vst.msk [vmem:[#allocation3 + $0xe] sm:$0xfc] %vm821_vm5, %v782_v3  ;;  %v1210_v3 = vmul.f32 %v1208_v35, %v1204_v63 }
 0x224   : > { %772 = vst.msk [vmem:[#allocation3 + $0x3f] sm:$0x1] %vm757_vm3, %v738_v6  ;;  %v774_v8 = vpop.permute.xlu1 %773 }
 0x225   : > { %822 = vst.msk [vmem:[#allocation3 - $0x2] sm:$0xfc] %vm821_vm5, %v774_v8 }
 0x228   : > { %1065 = vrot.lane.b32.xlu2 %v2196_v17, %s1871_s21  ;;  %1131 = vrot.lane.b32.xlu0 %v2196_v17, %s1870_s17 }
 0x22a   : > { %v794_v9 = vpop.permute.xlu2 %793  ;;  %890 = vrot.lane.b32.xlu1 %v2110_v31, %s1868_s15  ;;  %v778_v10 = vpop.permute.xlu0 %777 }
 0x22b   : > { %833 = vst.msk [vmem:[#allocation3 + $0x26] sm:$0xfc] %vm821_vm5, %v794_v9 }
 0x22c   : > { %825 = vst.msk [vmem:[#allocation3 + $0x6] sm:$0xfc] %vm821_vm5, %v778_v10  ;;  %v786_v11 = vpop.permute.xlu1 %785 }
 0x22d   : > { %829 = vst.msk [vmem:[#allocation3 + $0x16] sm:$0xfc] %vm821_vm5, %v786_v11 }
 0x230   : > { %1007 = vrot.lane.b32.xlu2 %v2124_v38, %s1873_s22  ;;  %902 = vrot.lane.b32.xlu0 %v2196_v17, %s1868_s15 }
 0x232   : > { %v841_v7 = vpop.permute.xlu2 %840  ;;  %904 = vrot.lane.b32.xlu1 %v2204_v18, %s1868_s15  ;;  %v790_v13 = vpop.permute.xlu0 %789 }
 0x233   : > { %865 = vst.msk [vmem:[#allocation3] sm:$0xff] %vm864_vm7, %v841_v7 }
 0x234   : > { %925 = vst.msk [vmem:[#allocation3 + $0x7] sm:$0x1] %vm924_vm8, %v2287_v28  ;;  %v798_v14 = vpop.permute.xlu1 %797  ;;  %v1207_v28 = vld [vmem:[#allocation7 + $0x70] sm:$0xf] }
 0x235   : > { %831 = vst.msk [vmem:[#allocation3 + $0x1e] sm:$0xfc] %vm821_vm5, %v790_v13  ;;  %v1213_v53 = vmul.f32 %v1208_v35, %v1207_v28  ;;  %v681_v13 = vrot.slane %v2204_v18, 4 }
 0x236   : > { %835 = vst.msk [vmem:[#allocation3 + $0x2e] sm:$0xfc] %vm821_vm5, %v798_v14 }
 0x237   : > { %871 = vst.msk [vmem:[#allocation3 + $0x30] sm:$0xff] %vm864_vm7, %v2328_v45  ;;  %v1176_v45 = vld [vmem:[#allocation7 + $0x10] sm:$0xff] }
 0x238   : > { %968 = vrot.lane.b32.xlu2 %v2196_v17, %s1869_s16  ;;  %956 = vrot.lane.b32.xlu0 %v2110_v31, %s1869_s16  ;;  %936 = vst.msk [vmem:[#allocation3 + $0x2f] sm:$0xfe] %vm922_vm9, %v899_v59  ;;  %v1182_v58 = vmul.f32 %v1179_v23, %v1176_v45 }
 0x239   : > { %1002 = vst.msk [vmem:[#allocation3 + $0x2e] sm:$0xfc] %vm988_vm10, %v2361_v55  ;;  %v1212_v55 = vmul.f32 %v1208_v35, %v1206_v42 }
 0x23a   : > { %v847_v15 = vpop.permute.xlu2 %846  ;;  %958 = vrot.lane.b32.xlu1 %v2270_v24, %s1869_s16  ;;  %v796_v16 = vpop.permute.xlu0 %795  ;;  %v1191_v24 = vperm.slane %v1173_v22, 1 }
 0x23b   : > { %868 = vst.msk [vmem:[#allocation3 + $0x18] sm:$0xff] %vm864_vm7, %v847_v15  ;;  %v1174_v15 = vld [vmem:[#allocation7] sm:$0xff] }
 0x23c   : > { %931 = vst.msk [vmem:[#allocation3 + $0x1f] sm:$0x1] %vm924_vm8, %v2332_v46  ;;  %v804_v37 = vpop.permute.xlu1 %803  ;;  %v1188_v46 = vld [vmem:[#allocation7 + $0x38] sm:$0xff] }
 0x23d   : > { %834 = vst.msk [vmem:[#allocation3 + $0x2e] sm:$0x3] %vm823_vm6, %v796_v16  ;;  %v1194_v59 = vmul.f32 %v1191_v24, %v1188_v46  ;;  %v1186_v16 = vld [vmem:[#allocation7 + $0x28] sm:$0xff] }
 0x23e   : > { %838 = vst.msk [vmem:[#allocation3 + $0x3e] sm:$0x3] %vm823_vm6, %v804_v37  ;;  %v1203_v37 = vld [vmem:[#allocation7 + $0x50] sm:$0xff] }
 0x23f   : > { %v1199_v10 = vadd.f32 %v1194_v59, %v1182_v58 }
 0x240   : > { %1043 = vrot.lane.b32.xlu2 %v2082_v2, %s1871_s21  ;;  %970 = vrot.lane.b32.xlu0 %v2204_v18, %s1869_s16 }
 0x241   : > { %v1216_v14 = vadd.f32 %v1211_v61, %v1199_v10 }
 0x242   : > { %v883_v31 = vpop.permute.xlu2 %882  ;;  %1041 = vrot.lane.b32.xlu1 %v2124_v38, %s1871_s21  ;;  %v843_v17 = vpop.permute.xlu0 %842 }
 0x243   : > { %866 = vst.msk [vmem:[#allocation3 + $0x8] sm:$0xff] %vm864_vm7, %v843_v17  ;;  %v1180_v17 = vmul.f32 %v1179_v23, %v1174_v15 }
 0x244   : > { %927 = vst.msk [vmem:[#allocation3 + $0xf] sm:$0x1] %vm924_vm8, %v2292_v32  ;;  %v845_v19 = vpop.permute.xlu1 %844  ;;  %v1196_v32 = vmul.f32 %v1191_v24, %v1190_v27 }
 0x245   : > { %867 = vst.msk [vmem:[#allocation3 + $0x10] sm:$0xff] %vm864_vm7, %v845_v19  ;;  %v1192_v19 = vmul.f32 %v1191_v24, %v1186_v16 }
 0x246   : > { %929 = vst.msk [vmem:[#allocation3 + $0x17] sm:$0x1] %vm924_vm8, %v2312_v41  ;;  %v1189_v41 = vld [vmem:[#allocation7 + $0x40] sm:$0xff] }
 0x247   : > { %928 = vst.msk [vmem:[#allocation3 + $0xf] sm:$0xfe] %vm922_vm9, %v883_v31  ;;  %v1195_v44 = vmul.f32 %v1191_v24, %v1189_v41  ;;  %v1197_v18 = vadd.f32 %v1192_v19, %v1180_v17 }
 0x248   : > { %1107 = vrot.lane.b32.xlu2 %v2124_v38, %s1870_s17  ;;  %1015 = vrot.lane.b32.xlu0 %v2116_v34, %s1873_s22  ;;  %995 = vst.msk [vmem:[#allocation3 + $0x16] sm:$0x3] %vm990_vm11, %v2344_v48  ;;  %v1201_v48 = vadd.f32 %v1196_v32, %v1184_v30 }
 0x249   : > { %v1200_v39 = vadd.f32 %v1195_v44, %v1183_v5 }
 0x24a   : > { %v2469_v20 = vpop.permute.xlu2 %960  ;;  %1021 = vrot.lane.b32.xlu1 %v2193_v12, %s1873_s22  ;;  %v849_v21 = vpop.permute.xlu0 %848  ;;  %v1218_v52 = vadd.f32 %v1213_v53, %v1201_v48 }
 0x24b   : > { %869 = vst.msk [vmem:[#allocation3 + $0x20] sm:$0xff] %vm864_vm7, %v849_v21  ;;  %v1217_v9 = vadd.f32 %v1212_v55, %v1200_v39  ;;  %v1209_v21 = vmul.f32 %v1208_v35, %v1203_v37 }
 0x24c   : > { %v851_v25 = vpop.permute.xlu1 %850  ;;  %1587 = vmatpush.msk.msra.mxu2 %vm387_vm0, %v1218_v52  ;;  %1588 = vmatpush.msk.msra.mxu3 %vm387_vm0, %v1218_v52 }
 0x24d   : > { %870 = vst.msk [vmem:[#allocation3 + $0x28] sm:$0xff] %vm864_vm7, %v851_v25  ;;  %1571 = vmatpush.msk.msra.mxu1 %vm387_vm0, %v1218_v52  ;;  %v1214_v22 = vadd.f32 %v1209_v21, %v1197_v18  ;;  %vm1157_vm0 = vcmask 288000   ;;  %v1229_v21 = vld [vmem:[#allocation2 + $0x18] sm:$0xff] }
 0x24e   : > { %935 = vst.msk [vmem:[#allocation3 + $0x2f] sm:$0x1] %vm924_vm8, %v2298_v33  ;;  %v1187_v33 = vld [vmem:[#allocation7 + $0x30] sm:$0xff]  ;;  %1589 = vmatpush.msra.mxu2 %v1217_v9  ;;  %1590 = vmatpush.msra.mxu3 %v1217_v9 }
 0x24f   : > { %v1193_v1 = vmul.f32 %v1191_v24, %v1187_v33  ;;  %1275 = vmatpush.msra.mxu1 %v1217_v9 }
 0x250   : > { %1059 = vrot.lane.b32.xlu2 %v2181_v4, %s1871_s21  ;;  %1109 = vrot.lane.b32.xlu0 %v2082_v2, %s1870_s17 }
 0x251   : > { %v1198_v11 = vadd.f32 %v1193_v1, %v1181_v0  ;;  %1591 = vmatpush.msra.mxu2 %v1216_v14  ;;  %1592 = vmatpush.msra.mxu3 %v1216_v14 }
 0x252   : > { %v887_v6 = vpop.permute.xlu2 %886  ;;  %1057 = vrot.lane.b32.xlu1 %v2116_v34, %s1871_s21  ;;  %v879_v8 = vpop.permute.xlu0 %878  ;;  %1276 = vmatpush.msra.mxu1 %v1216_v14 }
 0x253   : > { %930 = vst.msk [vmem:[#allocation3 + $0x17] sm:$0xfe] %vm922_vm9, %v887_v6  ;;  %v1215_v31 = vadd.f32 %v1210_v3, %v1198_v11 }
 0x254   : > { %997 = vst.msk [vmem:[#allocation3 + $0x1e] sm:$0x3] %vm990_vm11, %v2367_v57  ;;  %v875_v7 = vpop.permute.xlu1 %874  ;;  %v682_v57 = vsel %vm469_vm2, 0.0, %v681_v13 }
 0x255   : > { %926 = vst.msk [vmem:[#allocation3 + $0x7] sm:$0xfe] %vm922_vm9, %v879_v8  ;;  %1593 = vmatpush.msra.mxu2 %v1215_v31  ;;  %1594 = vmatpush.msra.mxu3 %v1215_v31 }
 0x256   : > { %923 = vst.msk [vmem:[#allocation3 - $0x1] sm:$0xfe] %vm922_vm9, %v875_v7  ;;  %1277 = vmatpush.msra.mxu1 %v1215_v31 }
 0x257   : > { %991 = vst.msk [vmem:[#allocation3 + $0x6] sm:$0x3] %vm990_vm11, %v2342_v50  ;;  %1595 = vmatpush.msra.mxu2 %v1214_v22  ;;  %1596 = vmatpush.msra.mxu3 %v1214_v22 }
 0x258   : > { %1123 = vrot.lane.b32.xlu2 %v2116_v34, %s1870_s17  ;;  %1069 = vrot.lane.b32.xlu0 %v2193_v12, %s1871_s21 }
 0x259   : > { %1278 = vmatpush.msra.mxu1 %v1214_v22  ;;  %v1232_v22 = vld [vmem:[#allocation2 + $0x20] sm:$0xff] }
 0x25a   : > { %v901_v23 = vpop.permute.xlu2 %900  ;;  %1071 = vrot.lane.b32.xlu1 %v682_v57, %s1871_s21  ;;  %v949_v24 = vpop.permute.xlu0 %948 }
 0x25b   : > { %937 = vst.msk [vmem:[#allocation3 + $0x37] sm:$0x1] %vm924_vm8, %v901_v23 }
 0x25c   : > { %994 = vst.msk [vmem:[#allocation3 + $0xe] sm:$0xfc] %vm988_vm10, %v949_v24  ;;  %v895_v34 = vpop.permute.xlu1 %894 }
 0x25d   : > { %934 = vst.msk [vmem:[#allocation3 + $0x27] sm:$0xfe] %vm922_vm9, %v895_v34  ;;  %v1230_v34 = vld [vmem:[#allocation2 + $0x10] sm:$0xff] }
 0x25e   : > { %1000 = vst.msk [vmem:[#allocation3 + $0x26] sm:$0xfc] %vm988_vm10, %v2469_v20 }
 0x25f   : > { %1001 = vst.msk [vmem:[#allocation3 + $0x2e] sm:$0x3] %vm990_vm11, %v2321_v43 }
 0x260   : > { %1125 = vrot.lane.b32.xlu0 %v2181_v4, %s1870_s17  ;;  %1137 = vrot.lane.b32.xlu2 %v682_v57, %s1870_s17  ;;  %1037 = vst.msk [vmem:[#allocation3 + $0x28] sm:$0xff] %vm1031_vm12, %v2338_v49 }
 0x261   : > { %1101 = vst.msk [vmem:[#allocation3 + $0x27] sm:$0xfe] %vm1089_vm13, %v2350_v51 }
 0x262   : > { %v1122_v50 = vpop.permute.xlu2 %1121  ;;  %1135 = vrot.lane.b32.xlu1 %v2193_v12, %s1870_s17  ;;  %v1050_v20 = vpop.permute.xlu0 %1049  ;;  %1167 = vst.msk [vmem:[#allocation3 + $0x26] sm:$0xfc] %vm1155_vm14, %v2365_v56 }
 0x264   : > { %v1012_v43 = vpop.permute.xlu1 %1011 }
 0x265   : > { %1034 = vst.msk [vmem:[#allocation3 + $0x10] sm:$0xff] %vm1031_vm12, %v1012_v43  ;;  %v1233_v43 = vld [vmem:[#allocation2 + $0x28] sm:$0xff] }
 0x266   : > { %1096 = vst.msk [vmem:[#allocation3 + $0x17] sm:$0x1] %vm1091_vm15, %v2355_v54 }
 0x267   : > { %1095 = vst.msk [vmem:[#allocation3 + $0xf] sm:$0xfe] %vm1089_vm13, %v1050_v20 }
 0x268   : > { %944 = vrot.lane.b32.xlu0 %v2124_v38, %s1869_s16  ;;  %1009 = vrot.lane.b32.xlu2 %v2107_v29, %s1873_s22  ;;  %1162 = vst.msk [vmem:[#allocation3 + $0x16] sm:$0x3] %vm1157_vm0, %v2308_v40 }
 0x26a   : > { %v941_v4 = vpop.permute.xlu2 %940  ;;  %946 = vrot.lane.b32.xlu1 %v2082_v2, %s1869_s16  ;;  %v1064_v12 = vpop.permute.xlu0 %1063 }
 0x26b   : > { %989 = vst.msk [vmem:[#allocation3 - $0x2] sm:$0xfc] %vm988_vm10, %v941_v4 }
 0x26c   : > { %1102 = vst.msk [vmem:[#allocation3 + $0x2f] sm:$0x1] %vm1091_vm15, %v1064_v12  ;;  %v1116_v49 = vpop.permute.xlu1 %1115 }
 0x26d   : > { %1161 = vst.msk [vmem:[#allocation3 + $0xe] sm:$0xfc] %vm1155_vm14, %v1116_v49  ;;  %v1227_v49 = vld [vmem:[#allocation2 + $0x30] sm:$0xff] }
 0x270   : > { %1045 = vrot.lane.b32.xlu0 %v2107_v29, %s1871_s21  ;;  %1111 = vrot.lane.b32.xlu2 %v2107_v29, %s1870_s17 }
 0x272   : > { %v893_v38 = vpop.permute.xlu2 %892  ;;  %1047 = vrot.lane.b32.xlu1 %v2169_v60, %s1871_s21  ;;  %v953_v40 = vpop.permute.xlu0 %952 }
 0x273   : > { %933 = vst.msk [vmem:[#allocation3 + $0x27] sm:$0x1] %vm924_vm8, %v893_v38 }
 0x274   : > { %996 = vst.msk [vmem:[#allocation3 + $0x16] sm:$0xfc] %vm988_vm10, %v953_v40  ;;  %v1130_v2 = vpop.permute.xlu1 %1129  ;;  %v1221_v51 = vld [vmem:[#allocation3 + $0x10] sm:$0xff] }
 0x275   : > { %1168 = vst.msk [vmem:[#allocation3 + $0x2e] sm:$0x3] %vm1157_vm0, %v1130_v2  ;;  %1574 = vmatmul.msk.f32.vlgmr.msra.gmra.mxu2 %vm1235_vm1, %v1221_v51  ;;  %v1231_v2 = vld [vmem:[#allocation2 + $0x8] sm:$0xff] }
 0x278   : > { %1113 = vrot.lane.b32.xlu0 %v2169_v60, %s1870_s17 }
 0x27a   : > { %v1020_v29 = vpop.permute.xlu2 %1019  ;;  %v967_v54 = vpop.permute.xlu0 %966 }
 0x27b   : > { %1003 = vst.msk [vmem:[#allocation3 + $0x36] sm:$0x3] %vm990_vm11, %v967_v54 }
 0x27c   : > { %1038 = vst.msk [vmem:[#allocation3 + $0x30] sm:$0xff] %vm1031_vm12, %v1020_v29  ;;  %v1014_v56 = vpop.permute.xlu1 %1013  ;;  %v1224_v25 = vld [vmem:[#allocation3 + $0x28] sm:$0xff]  ;;  %v1234_v29 = vld [vmem:[#allocation2 + $0x38] sm:$0xff] }
 0x27d   : > { %1035 = vst.msk [vmem:[#allocation3 + $0x18] sm:$0xff] %vm1031_vm12, %v1014_v56  ;;  %1577 = vmatmul.msk.f32.vlgmr.msra.gmra.mxu3 %vm1235_vm1, %v1224_v25 }
 0x282   : > { %v1066_v26 = vpop.permute.xlu2 %1065  ;;  %v1054_v27 = vpop.permute.xlu0 %1053 }
 0x283   : > { %1103 = vst.msk [vmem:[#allocation3 + $0x2f] sm:$0xfe] %vm1089_vm13, %v1066_v26  ;;  %v1228_v26 = vld [vmem:[#allocation2] sm:$0xff] }
 0x284   : > { %1097 = vst.msk [vmem:[#allocation3 + $0x17] sm:$0xfe] %vm1089_vm13, %v1054_v27  ;;  %v1056_v28 = vpop.permute.xlu1 %1055 }
 0x285   : > { %1098 = vst.msk [vmem:[#allocation3 + $0x1f] sm:$0x1] %vm1091_vm15, %v1056_v28 }
 0x286   : > { %1164 = vst.msk [vmem:[#allocation3 + $0x1e] sm:$0x3] %vm1157_vm0, %v1122_v50 }
 0x28a   : > { %v1008_v60 = vpop.permute.xlu2 %1007  ;;  %v1068_v30 = vpop.permute.xlu0 %1067 }
 0x28b   : > { %1032 = vst.msk [vmem:[#allocation3] sm:$0xff] %vm1031_vm12, %v1008_v60 }
 0x28c   : > { %1104 = vst.msk [vmem:[#allocation3 + $0x37] sm:$0x1] %vm1091_vm15, %v1068_v30  ;;  %v1120_v32 = vpop.permute.xlu1 %1119 }
 0x28d   : > { %1163 = vst.msk [vmem:[#allocation3 + $0x16] sm:$0xfc] %vm1155_vm14, %v1120_v32 }
 0x292   : > { %v969_v35 = vpop.permute.xlu2 %968  ;;  %v855_v36 = vpop.permute.xlu0 %854 }
 0x293   : > { %872 = vst.msk [vmem:[#allocation3 + $0x38] sm:$0xff] %vm864_vm7, %v855_v36 }
 0x294   : > { %v1134_v41 = vpop.permute.xlu1 %1133  ;;  %v1222_v42 = vld [vmem:[#allocation3 + $0x18] sm:$0xff] }
 0x295   : > { %1170 = vst.msk [vmem:[#allocation3 + $0x36] sm:$0x3] %vm1157_vm0, %v1134_v41  ;;  %1575 = vmatmul.msk.f32.gmra.mxu2 %vm1235_vm1, %v1222_v42 }
 0x29a   : > { %v1044_v5 = vpop.permute.xlu2 %1043  ;;  %v1132_v44 = vpop.permute.xlu0 %1131 }
 0x29b   : > { %1092 = vst.msk [vmem:[#allocation3 + $0x7] sm:$0x1] %vm1091_vm15, %v1044_v5 }
 0x29c   : > { %1169 = vst.msk [vmem:[#allocation3 + $0x2e] sm:$0xfc] %vm1155_vm14, %v1132_v44  ;;  %v891_v45 = vpop.permute.xlu1 %890 }
 0x29d   : > { %932 = vst.msk [vmem:[#allocation3 + $0x1f] sm:$0xfe] %vm922_vm9, %v891_v45 }
 0x2a2   : > { %v903_v46 = vpop.permute.xlu0 %902  ;;  %v1108_v58 = vpop.permute.xlu2 %1107 }
 0x2a3   : > { %938 = vst.msk [vmem:[#allocation3 + $0x37] sm:$0xfe] %vm922_vm9, %v903_v46  ;;  %v1225_v47 = vld [vmem:[#allocation3 + $0x30] sm:$0xff] }
 0x2a4   : > { %1004 = vst.msk [vmem:[#allocation3 + $0x36] sm:$0xfc] %vm988_vm10, %v969_v35  ;;  %1578 = vmatmul.msk.f32.gmra.mxu3 %vm1235_vm1, %v1225_v47  ;;  %v905_v48 = vpop.permute.xlu1 %904 }
 0x2a5   : > { %939 = vst.msk [vmem:[#allocation3 + $0x3f] sm:$0x1] %vm924_vm8, %v905_v48 }
 0x2aa   : > { %v957_v53 = vpop.permute.xlu0 %956  ;;  %v1060_v61 = vpop.permute.xlu2 %1059 }
 0x2ab   : > { %998 = vst.msk [vmem:[#allocation3 + $0x1e] sm:$0xfc] %vm988_vm10, %v957_v53 }
 0x2ac   : > { %v959_v55 = vpop.permute.xlu1 %958 }
 0x2ad   : > { %999 = vst.msk [vmem:[#allocation3 + $0x26] sm:$0x3] %vm990_vm11, %v959_v55 }
 0x2b2   : > { %v971_v39 = vpop.permute.xlu0 %970  ;;  %v1124_v52 = vpop.permute.xlu2 %1123 }
 0x2b3   : > { %1005 = vst.msk [vmem:[#allocation3 + $0x3e] sm:$0x3] %vm990_vm11, %v971_v39 }
 0x2b4   : > { %v1042_v59 = vpop.permute.xlu1 %1041 }
 0x2b5   : > { %1090 = vst.msk [vmem:[#allocation3 - $0x1] sm:$0xfe] %vm1089_vm13, %v1042_v59 }
 0x2b6   : > { %1156 = vst.msk [vmem:[#allocation3 - $0x2] sm:$0xfc] %vm1155_vm14, %v1108_v58 }
 0x2ba   : > { %v1016_v62 = vpop.permute.xlu0 %1015  ;;  %v1138_v8 = vpop.permute.xlu2 %1137 }
 0x2bb   : > { %1036 = vst.msk [vmem:[#allocation3 + $0x20] sm:$0xff] %vm1031_vm12, %v1016_v62 }
 0x2bc   : > { %1100 = vst.msk [vmem:[#allocation3 + $0x27] sm:$0x1] %vm1091_vm15, %v1060_v61  ;;  %v1022_v33 = vpop.permute.xlu1 %1021 }
 0x2bd   : > { %1039 = vst.msk [vmem:[#allocation3 + $0x38] sm:$0xff] %vm1031_vm12, %v1022_v33 }
 0x2c2   : > { %v1110_v63 = vpop.permute.xlu0 %1109  ;;  %v1010_v11 = vpop.permute.xlu2 %1009 }
 0x2c3   : > { %1158 = vst.msk [vmem:[#allocation3 + $0x6] sm:$0x3] %vm1157_vm0, %v1110_v63 }
 0x2c4   : > { %v1058_v0 = vpop.permute.xlu1 %1057 }
 0x2c5   : > { %1099 = vst.msk [vmem:[#allocation3 + $0x1f] sm:$0xfe] %vm1089_vm13, %v1058_v0 }
 0x2c6   : > { %1165 = vst.msk [vmem:[#allocation3 + $0x1e] sm:$0xfc] %vm1155_vm14, %v1124_v52 }
 0x2ca   : > { %v1070_v1 = vpop.permute.xlu0 %1069  ;;  %v1219_v3 = vld [vmem:[#allocation3] sm:$0xff]  ;;  %v1112_v37 = vpop.permute.xlu2 %1111 }
 0x2cb   : > { %1105 = vst.msk [vmem:[#allocation3 + $0x37] sm:$0xfe] %vm1089_vm13, %v1070_v1  ;;  %1572 = vmatmul.msk.f32.vlgmr.msra.gmra.mxu1 %vm1235_vm1, %v1219_v3 }
 0x2cc   : > { %v1072_v6 = vpop.permute.xlu1 %1071 }
 0x2cd   : > { %1106 = vst.msk [vmem:[#allocation3 + $0x3f] sm:$0x1] %vm1091_vm15, %v1072_v6 }
 0x2ce   : > { %1172 = vst.msk [vmem:[#allocation3 + $0x3e] sm:$0x3] %vm1157_vm0, %v1138_v8 }
 0x2d2   : > { %v1126_v9 = vpop.permute.xlu0 %1125 }
 0x2d3   : > { %1166 = vst.msk [vmem:[#allocation3 + $0x26] sm:$0x3] %vm1157_vm0, %v1126_v9 }
 0x2d4   : > { %v1136_v10 = vpop.permute.xlu1 %1135 }
 0x2d5   : > { %1171 = vst.msk [vmem:[#allocation3 + $0x36] sm:$0xfc] %vm1155_vm14, %v1136_v10 }
 0x2da   : > { %v945_v7 = vpop.permute.xlu0 %944  ;;  %v1223_v13 = vld [vmem:[#allocation3 + $0x20] sm:$0xff] }
 0x2db   : > { %992 = vst.msk [vmem:[#allocation3 + $0x6] sm:$0xfc] %vm988_vm10, %v945_v7  ;;  %1576 = vmatmul.msk.f32.gmra.mxu2 %vm1235_vm1, %v1223_v13 }
 0x2dc   : > { %v947_v14 = vpop.permute.xlu1 %946  ;;  %v1226_v15 = vld [vmem:[#allocation3 + $0x38] sm:$0xff] }
 0x2dd   : > { %993 = vst.msk [vmem:[#allocation3 + $0xe] sm:$0x3] %vm990_vm11, %v947_v14  ;;  %1579 = vmatmul.msk.f32.gmra.mxu3 %vm1235_vm1, %v1226_v15 }
 0x2de   : > { %1033 = vst.msk [vmem:[#allocation3 + $0x8] sm:$0xff] %vm1031_vm12, %v1010_v11 }
 0x2e2   : > { %v1046_v16 = vpop.permute.xlu0 %1045 }
 0x2e3   : > { %1093 = vst.msk [vmem:[#allocation3 + $0x7] sm:$0xfe] %vm1089_vm13, %v1046_v16 }
 0x2e4   : > { %1159 = vst.msk [vmem:[#allocation3 + $0x6] sm:$0xfc] %vm1155_vm14, %v1112_v37  ;;  %v1048_v31 = vpop.permute.xlu1 %1047 }
 0x2e5   : > { %1094 = vst.msk [vmem:[#allocation3 + $0xf] sm:$0x1] %vm1091_vm15, %v1048_v31 }
 0x2ea   : > { %v1114_v17 = vpop.permute.xlu0 %1113 }
 0x2eb   : > { %1160 = vst.msk [vmem:[#allocation3 + $0xe] sm:$0x3] %vm1157_vm0, %v1114_v17 }
 0x2f2   : > { %v1220_v19 = vld [vmem:[#allocation3 + $0x8] sm:$0xff] }
 0x2f3   : > { %1573 = vmatmul.msk.f32.gmra.mxu1 %vm1235_vm1, %v1220_v19 }
 0x2f8   : > { %v1286_v18 = vpop.f32.mrf.mxu2 }
 0x2f9   : > { %v1306_v57 = vadd.f32 %v1286_v18, %v1229_v21 }
 0x2fb   : > { %1314 = vst [vmem:[#allocation2 + $0x18] sm:$0xff] %v1306_v57 }
 0x300   : > { %v1295_v23 = vpop.f32.mrf.mxu3 }
 0x301   : > { %v1309_v24 = vadd.f32 %v1295_v23, %v1232_v22 }
 0x303   : > { %1317 = vst [vmem:[#allocation2 + $0x20] sm:$0xff] %v1309_v24 }
 0x318   : > { %v1289_v50 = vpop.f32.mrf.mxu2 }
 0x319   : > { %v1307_v20 = vadd.f32 %v1289_v50, %v1230_v34 }
 0x31b   : > { %1315 = vst [vmem:[#allocation2 + $0x10] sm:$0xff] %v1307_v20 }
 0x327   : > { %v1298_v4 = vpop.f32.mrf.mxu3 }
 0x328   : > { %v1310_v12 = vadd.f32 %v1298_v4, %v1233_v43 }
 0x32a   : > { %1318 = vst [vmem:[#allocation2 + $0x28] sm:$0xff] %v1310_v12 }
 0x348   : > { %v1280_v38 = vpop.f32.mrf.mxu1 }
 0x349   : > { %v1304_v40 = vadd.f32 %v1280_v38, %v1227_v49 }
 0x34b   : > { %1312 = vst [vmem:[#allocation2 + $0x30] sm:$0xff] %v1304_v40 }
 0x35e   : > { %v1292_v51 = vpop.f32.mrf.mxu2 }
 0x35f   : > { %v1308_v54 = vadd.f32 %v1292_v51, %v1231_v2 }
 0x360   : > { %v1301_v56 = vpop.f32.mrf.mxu3 }
 0x361   : > { %1316 = vst [vmem:[#allocation2 + $0x8] sm:$0xff] %v1308_v54  ;;  %v1311_v25 = vadd.f32 %v1301_v56, %v1234_v29 }
 0x363   : > { %1319 = vst [vmem:[#allocation2 + $0x38] sm:$0xff] %v1311_v25 }
 0x370   : > { %v1283_v27 = vpop.f32.mrf.mxu1 }
 0x371   : > { %v1305_v28 = vadd.f32 %v1283_v27, %v1228_v26 }
 0x373   : > { %1313 = vst [vmem:[#allocation2] sm:$0xff] %v1305_v28 }
 0x374 PF: > { %p1580_p7 = scmp.ne.s32.totalorder %s1832_s0, 7 }
 0x376   : > { %1323 = sbr.rel (%p1580_p7) target bundleno = 1182 (0x49e), region = 56 }
 0x37b   : > { %v1324_v60 = vld [vmem:[#allocation2 + $0x30] sm:$0xff]  ;;  %v1705_v30 = vld [vmem:[%s2681_s6] ss:$0 sm:$0xff]  ;;  %v1326_v5 = vld [vmem:[#allocation2 + $0x18] sm:$0xff]  ;;  %vm1384_vm2 = vcmask 523264  }
 0x37c   : > { %v1336_v32 = vadd.f32 %v1705_v30, %v1324_v60  ;;  %v1325_v35 = vld [vmem:[#allocation2] sm:$0xff]  ;;  %v1338_v44 = vadd.f32 %v1705_v30, %v1326_v5  ;;  %v1327_v46 = vld [vmem:[#allocation2 + $0x10] sm:$0xff]  ;;  %v1328_v53 = vld [vmem:[#allocation2 + $0x8] sm:$0xff] }
 0x37d   : > { %v1337_v41 = vadd.f32 %v1705_v30, %v1325_v35  ;;  %v1339_v47 = vadd.f32 %v1705_v30, %v1327_v46  ;;  %v1340_v55 = vadd.f32 %v1705_v30, %v1328_v53  ;;  %v1329_v39 = vld [vmem:[#allocation2 + $0x20] sm:$0xff]  ;;  %v1330_v62 = vld [vmem:[#allocation2 + $0x28] sm:$0xff]  ;;  %v1331_v52 = vld [vmem:[#allocation2 + $0x38] sm:$0xff] }
 0x37e   : > { %v1344_v36 = vmax.f32 %v1336_v32, 0.0  ;;  %v1346_v45 = vmax.f32 %v1338_v44, 0.0  ;;  %v1341_v59 = vadd.f32 %v1705_v30, %v1329_v39  ;;  %v1342_v33 = vadd.f32 %v1705_v30, %v1330_v62 }
 0x37f   : > { %v1345_v42 = vmax.f32 %v1337_v41, 0.0  ;;  %v1347_v48 = vmax.f32 %v1339_v47, 0.0  ;;  %v1348_v58 = vmax.f32 %v1340_v55, 0.0  ;;  %v1343_v0 = vadd.f32 %v1705_v30, %v1331_v52 }
 0x380   : > { %1352 = vxpose.xlu0.b32.start [1/8] (short) %v1344_v36, 128  ;;  %v1349_v61 = vmax.f32 %v1341_v59, 0.0  ;;  %v1350_v63 = vmax.f32 %v1342_v33, 0.0 }
 0x381   : > { %v1351_v1 = vmax.f32 %v1343_v0, 0.0 }
 0x388   : > { %1353 = vxpose.xlu0.b32.cont [2/8] (short) %v1345_v42, 128 }
 0x390   : > { %1354 = vxpose.xlu0.b32.cont [3/8] (short) %v1346_v45, 128 }
 0x398   : > { %1355 = vxpose.xlu0.b32.cont [4/8] (short) %v1347_v48, 128 }
 0x3a0   : > { %1356 = vxpose.xlu0.b32.cont [5/8] (short) %v1348_v58, 128 }
 0x3a8   : > { %1357 = vxpose.xlu0.b32.cont [6/8] (short) %v1349_v61, 128 }
 0x3b0   : > { %1358 = vxpose.xlu0.b32.cont [7/8] (short) %v1350_v63, 128 }
 0x3b8   : > { %1359 = vxpose.xlu0.b32.end [8/8] (short) %v1351_v1, 128 }
 0x424   : > { %v1368_v3 = vpop.trf.xlu0 }
 0x425   : > { %1385 = vst.msk [vmem:[%s2018_s13] sm:$0xff] %vm1384_vm2, %v1368_v3 }
 0x42c   : > { %v1369_v6 = vpop.trf.xlu0 }
 0x42d   : > { %1386 = vst.msk [vmem:[%s2018_s13 + $0x8] sm:$0xff] %vm1384_vm2, %v1369_v6 }
 0x434   : > { %v1370_v8 = vpop.trf.xlu0 }
 0x435   : > { %1387 = vst.msk [vmem:[%s2018_s13 + $0x10] sm:$0xff] %vm1384_vm2, %v1370_v8 }
 0x43c   : > { %v1371_v9 = vpop.trf.xlu0 }
 0x43d   : > { %1388 = vst.msk [vmem:[%s2018_s13 + $0x18] sm:$0xff] %vm1384_vm2, %v1371_v9 }
 0x444   : > { %v1372_v10 = vpop.trf.xlu0 }
 0x445   : > { %1389 = vst.msk [vmem:[%s2018_s13 + $0x20] sm:$0xff] %vm1384_vm2, %v1372_v10 }
 0x44c   : > { %v1373_v11 = vpop.trf.xlu0 }
 0x44d   : > { %1390 = vst.msk [vmem:[%s2018_s13 + $0x28] sm:$0xff] %vm1384_vm2, %v1373_v11 }
 0x454   : > { %v1374_v7 = vpop.trf.xlu0 }
 0x455   : > { %1391 = vst.msk [vmem:[%s2018_s13 + $0x30] sm:$0xff] %vm1384_vm2, %v1374_v7 }
 0x45c   : > { %v1375_v13 = vpop.trf.xlu0 }
 0x45d   : > { %1392 = vst.msk [vmem:[%s2018_s13 + $0x38] sm:$0xff] %vm1384_vm2, %v1375_v13 }
 0x464   : > { %v1376_v14 = vpop.trf.xlu0 }
 0x465   : > { %1393 = vst.msk [vmem:[%s2018_s13 + $0x40] sm:$0xff] %vm1384_vm2, %v1376_v14 }
 0x46c   : > { %v1377_v15 = vpop.trf.xlu0 }
 0x46d   : > { %1394 = vst.msk [vmem:[%s2018_s13 + $0x48] sm:$0xff] %vm1384_vm2, %v1377_v15 }
 0x474   : > { %v1378_v16 = vpop.trf.xlu0 }
 0x475   : > { %1395 = vst.msk [vmem:[%s2018_s13 + $0x50] sm:$0xff] %vm1384_vm2, %v1378_v16 }
 0x47c   : > { %v1379_v37 = vpop.trf.xlu0 }
 0x47d   : > { %1396 = vst.msk [vmem:[%s2018_s13 + $0x58] sm:$0xff] %vm1384_vm2, %v1379_v37 }
 0x484   : > { %v1380_v31 = vpop.trf.xlu0 }
 0x485   : > { %1397 = vst.msk [vmem:[%s2018_s13 + $0x60] sm:$0xff] %vm1384_vm2, %v1380_v31 }
 0x48c   : > { %v1381_v17 = vpop.trf.xlu0 }
 0x48d   : > { %1398 = vst.msk [vmem:[%s2018_s13 + $0x68] sm:$0xff] %vm1384_vm2, %v1381_v17 }
 0x494   : > { %v1382_v19 = vpop.trf.xlu0 }
 0x495   : > { %1399 = vst.msk [vmem:[%s2018_s13 + $0x70] sm:$0xff] %vm1384_vm2, %v1382_v19 }
 0x49c   : > { %v1383_v21 = vpop.trf.xlu0 }
 0x49d   : > { %1400 = vst.msk [vmem:[%s2018_s13 + $0x78] sm:$0xff] %vm1384_vm2, %v1383_v21 }
 0x49e PF: > { %s1586_s0 = sshll.u32 %s1836_s10, 7  ;;  %s1417_s28 = sshll.u32 %s2018_s13, 4  ;;  %s1418_s28 = int_to_ptr.vmem [resolvable:$true] %s1417_s28 }
 0x49f   : > { %s1416_s26 = scalar_lea.hbm %s2682_s7, %s1586_s0  ;;  %s2694_s14 = sand.u32 1, %s1824_s8  }
 0x4a0   : > { %s1419_s29 = sshll.u32 %s1416_s26, 4  ;;  %s1402_s5 = scalar_lea.sflag [#allocation9], %s2694_s14  ;;  %s1420_s29 = int_to_ptr.hbm [resolvable:$true] %s1419_s29 }
 0x4a1   : > { %s1762_s15 = sshra.s32 %s1420_s29, 4  ;;  %s1768_s10 = scalar_lea.hbm %s2682_s7, 256  ;;  %s1763_s15 = int_to_ptr.hbm [resolvable:$true] %s1762_s15 }
 0x4a2   : > { %s1764_s16 = scalar_lea.hbm %s1763_s15, 128  ;;  %p1769_p12 = scmp.lt.s32.totalorder %s1763_s15, %s2682_s7 }
 0x4a3   : > { %p1765_p8 = scmp.ne.s32.totalorder %s1763_s15, %s1764_s16  ;;  %p1770_p13 = scmp.lt.s32.totalorder %s1768_s10, %s1764_s16 }
 0x4a5   : > { %p1766_p10 = pnand %p1765_p8, %p1972_p3  ;;  %p1771_p0 = por %p1770_p13, %p1769_p12 }
 0x4a7   : > { %p1767_p11 = pneg %p1766_p10 }
 0x4a9   : > { %p1772_p1 = pnand %p1771_p0, %p1767_p11 }
 0x4ab   : > { %1775 = shalt.err (!%p1772_p1)
}
 0x4ac   : > { %s1874_s13 = smov 128   ;;  %s1875_s27 = smov 8  }
 0x4ad   : > { %1601 = dma.vmem_to_hbm [thread:$0]  (%p1972_p3), %s1418_s28, 2048, %s1420_s29, %s1402_s5, %s1874_s13, %s1874_s13, %s1875_s27  }
 0x4ae PF: > { %p1613_p2 = scmp.ge.s32.totalorder %s1848_s12, 2  ;;  %s1434_s23 = sand.u32 1, %s1820_s30  }
 0x4af   : > { %s1435_s0 = scalar_lea.sflag [#allocation9], %s1434_s23 }
 0x4b0   : > { %p1608_p4 = pnand %p1613_p2, %p1982_p9 }
 0x4b2   : > { %p1609_p5 = pneg %p1608_p4 }
 0x4b4   : > { %1815 = dma.done.wait (%p1609_p5), %s1435_s0, 2048  }
 0x4b5   : > { %1817 = vsyncadd (%p1609_p5), %s1435_s0, 4294965248  ;;  %s30_s12 = sadd.s32 1, %s1848_s12   ;;  %s2695_s10 = sld [smem:[#allocation14_spill]] }
 0x4b6   : > { %p27_p6 = scmp.ge.s32.totalorder %s30_s12, 18   ;;  %s2696_s18 = sld [smem:[#allocation15_spill]] }
 0x4b7   : > { %s2697_s11 = sld [smem:[#allocation16_spill]]  ;;  %s2698_s30 = smov %s1824_s8 }
 0x4b8   : > { %s2699_s8 = smov %s1828_s9  ;;  %s2700_s9 = smov %s1998_s25 }
 0x4b9   : > { %s2701_s0 = smov %s1840_s1  ;;  %29 = sbr.rel (!%p27_p6) target bundleno = 13 (0xd), region = 100 }
 0x4bc   : > { %s2702_s1 = smov %s2696_s18 }
 0x4be   :  { %1441 = vsyncpa [#allocation8], 1 }
 0x4bf   :  { %1443 = vsyncpa [#allocation8 + $0x1], 1 }
 0x4c0   :  { %1444 = vsyncpa [#allocation9], 1 }
 0x4c1   :  { %1446 = vsyncpa [#allocation9 + $0x1], 1 }

</bundles_post_ra>
